<compile_context>
chip_gen: v6e
topology: v6e:2x2x1
jax: 0.10.0
libtpu: 0.0.40
codegen_flags: <defaults>
</compile_context>

<pallas_src>
import math
import functools

import jax
import jax.numpy as jnp
from jax.experimental import pallas as pl
from jax.experimental.pallas import tpu as pltpu

_F32 = jnp.float32
_BF16 = jnp.bfloat16


# ----------------------------- in-kernel helpers -----------------------------

def _head_mask_bool(d_model, d_k):
    """(D, D) block-diagonal head mask built in-kernel from 2-D iota.

    Uses floor((i + 0.5) / d_k) in f32 (no integer division needed); the +0.5
    keeps values away from integer boundaries so the floor is exact for any d_k.
    """
    ri = jax.lax.broadcasted_iota(jnp.int32, (d_model, d_model), 0).astype(_F32)
    ci = jax.lax.broadcasted_iota(jnp.int32, (d_model, d_model), 1).astype(_F32)
    inv = 1.0 / d_k
    return jnp.floor((ri + 0.5) * inv) == jnp.floor((ci + 0.5) * inv)


def _fused_attn_math(xq, xk, xv, wqkv_ref, bqkv_ref, wo_ref, bo_ref, o_ref, *,
                     bb, n_tok, d_k):
    """Linear attention for `bb` stacked batches fully resident in VMEM.

    xq/xk/xv: (bb*n_tok, D) bf16 activations (may all be the same value for
    self-attention).  Stage order: finish the q path before projecting k/v
    (short live ranges); token-axis sums of exp(k) run on the MXU.
    """
    D = wo_ref.shape[0]
    inv_sqrt_dk = 1.0 / math.sqrt(d_k)
    hbool = _head_mask_bool(D, d_k)
    hmask_bf16 = hbool.astype(_BF16)

    # ---- Q path: project, per-head softmax over d_k lanes, then release ----
    q = jnp.dot(xq, wqkv_ref[:, :D], preferred_element_type=_F32) + bqkv_ref[:, :D]
    # exp(q - rowmax) is a valid per-head stabilizer (rowmax >= per-head max).
    eq = jnp.exp(q - jnp.max(q, axis=-1, keepdims=True))
    # per-head denominators via one block-diagonal mask matmul (MXU, no head loop)
    denom = jnp.dot(eq.astype(_BF16), hmask_bf16, preferred_element_type=_F32)
    q_soft = eq * (pl.reciprocal(denom, approx=True) * inv_sqrt_dk)       # (M, D) f32

    # ---- K / V projections (separate matmuls against ref-view weight slices)
    k = (jnp.dot(xk, wqkv_ref[:, D:2 * D], preferred_element_type=_F32)
         + bqkv_ref[:, D:2 * D])                                          # (M, D) f32
    v = (jnp.dot(xv, wqkv_ref[:, 2 * D:], preferred_element_type=_F32)
         + bqkv_ref[:, 2 * D:]).astype(_BF16)                             # (M, D) bf16

    ones_row = jnp.ones((1, n_tok), _BF16)
    wo = wo_ref[...]
    bo = bo_ref[...]
    for b in range(bb):                       # static python loop, bb is tiny
        lo, hi = b * n_tok, (b + 1) * n_tok
        kb = k[lo:hi]
        ekb = jnp.exp(kb - jnp.max(kb, axis=0, keepdims=True)).astype(_BF16)
        # token-axis sum on the MXU instead of a sublane XLU reduce
        colsum = jnp.dot(ones_row, ekb, preferred_element_type=_F32)      # (1, D)
        raw = jax.lax.dot_general(ekb, v[lo:hi], (((0,), (0,)), ((), ())),
                                  preferred_element_type=_F32)            # (D, D)
        ctx = jnp.where(hbool, raw, 0.0).astype(_BF16)                    # block-diag
        fold = jnp.dot(ctx, wo, preferred_element_type=_F32).astype(_BF16)  # (D, D)
        # 1/colsum folded into q's columns (lane-aligned broadcast, no transpose)
        qb = (q_soft[lo:hi] * pl.reciprocal(colsum, approx=True)).astype(_BF16)
        out_b = jnp.dot(qb, fold, preferred_element_type=_F32) + bo        # (N, D)
        o_ref[lo:hi, :] = out_b.astype(o_ref.dtype)


# ------------------------------ fused-path kernels ---------------------------

def _fused_self_kernel(x_ref, wqkv_ref, bqkv_ref, wo_ref, bo_ref, o_ref, *,
                       bb, n_tok, d_k):
    """Self-attention (query == key == value): x loaded/cast once, used 3x."""
    x = x_ref[...].astype(_BF16)
    _fused_attn_math(x, x, x, wqkv_ref, bqkv_ref, wo_ref, bo_ref, o_ref,
                     bb=bb, n_tok=n_tok, d_k=d_k)


def _fused_cross_kernel(q_ref, k_ref, v_ref, wqkv_ref, bqkv_ref, wo_ref, bo_ref,
                        o_ref, *, bb, n_tok, d_k):
    """General path with distinct query / key / value inputs."""
    _fused_attn_math(q_ref[...].astype(_BF16), k_ref[...].astype(_BF16),
                     v_ref[...].astype(_BF16), wqkv_ref, bqkv_ref, wo_ref,
                     bo_ref, o_ref, bb=bb, n_tok=n_tok, d_k=d_k)


# --------------------------- token-tiled path kernels ------------------------

def _ctx_tiled_kernel(k_in_ref, v_in_ref, wqkv_ref, bqkv_ref, wo_ref, fold_ref,
                      m_scr, s_scr, c_scr, *, d_k):
    """Pass 1: stream (tile, D) k/v tiles; online-max accumulate the token
    softmax of k and the K^T V context; emit the folded (D,D) context per batch.

    Works in the k^T (D, tile) orientation so the running max, exp-sum and the
    final 1/sum all live as (D, 1) columns (pure lane-broadcasts, no vector
    transposes)."""
    D = wo_ref.shape[0]
    t = pl.program_id(1)

    @pl.when(t == 0)
    def _():
        m_scr[...] = jnp.full(m_scr.shape, -jnp.inf, m_scr.dtype)
        s_scr[...] = jnp.zeros(s_scr.shape, s_scr.dtype)
        c_scr[...] = jnp.zeros(c_scr.shape, c_scr.dtype)

    xk = k_in_ref[...].astype(_BF16)                                      # (tn, D)
    xv = v_in_ref[...].astype(_BF16)
    kT = (jnp.dot(xk, wqkv_ref[:, D:2 * D], preferred_element_type=_F32)
          + bqkv_ref[:, D:2 * D]).T                                       # (D, tn)
    v_bf = (jnp.dot(xv, wqkv_ref[:, 2 * D:], preferred_element_type=_F32)
            + bqkv_ref[:, 2 * D:]).astype(_BF16)                          # (tn, D)

    m_prev = m_scr[...]                                                   # (D, 1)
    m_new = jnp.maximum(m_prev, jnp.max(kT, axis=-1, keepdims=True))
    alpha = jnp.exp(m_prev - m_new)                                       # (D, 1)
    ekT = jnp.exp(kT - m_new)                                             # (D, tn)
    s_scr[...] = alpha * s_scr[...] + jnp.sum(ekT, axis=-1, keepdims=True)
    c_scr[...] = alpha * c_scr[...] + jnp.dot(ekT.astype(_BF16), v_bf,
                                              preferred_element_type=_F32)
    m_scr[...] = m_new

    @pl.when(t == pl.num_programs(1) - 1)
    def _():
        hbool = _head_mask_bool(D, d_k)
        ctx = jnp.where(hbool,
                        c_scr[...] * pl.reciprocal(s_scr[...], approx=True),
                        0.0)                                              # (D, D)
        fold_ref[...] = jnp.dot(ctx.astype(_BF16), wo_ref[...],
                                preferred_element_type=_F32).astype(fold_ref.dtype)


def _out_tiled_kernel(q_in_ref, fold_ref, wqkv_ref, bqkv_ref, bo_ref, o_ref, *,
                      d_k):
    """Pass 2: stream q tiles; per-head q softmax; multiply by the folded ctx."""
    D = fold_ref.shape[-1]
    inv_sqrt_dk = 1.0 / math.sqrt(d_k)
    x = q_in_ref[...].astype(_BF16)                                       # (tq, D)
    q = jnp.dot(x, wqkv_ref[:, :D], preferred_element_type=_F32) + bqkv_ref[:, :D]
    eq = jnp.exp(q - jnp.max(q, axis=-1, keepdims=True))
    hmask = _head_mask_bool(D, d_k).astype(_BF16)
    denom = jnp.dot(eq.astype(_BF16), hmask, preferred_element_type=_F32)
    q_soft = (eq * (pl.reciprocal(denom, approx=True) * inv_sqrt_dk)).astype(_BF16)
    o_ref[...] = (jnp.dot(q_soft, fold_ref[...], preferred_element_type=_F32)
                  + bo_ref[...]).astype(o_ref.dtype)


# ---------------------------------- wrapper -----------------------------------

def multih_attention(query, key, value, params, nhead, src_mask=None, *,
                     token_block=None, batch_block=None):
    """MultihAttention.forward.  query/key/value: [B, N, d_model] -> same shape.

    token_block: if set and N > token_block, use the token-tiled (two-pass)
        path so only (token_block, D) activation tiles are resident in VMEM
        (v7x 64 MiB fit + pipeline depth).  Must divide N.
    batch_block: batches per grid step on the fused path (default: all of B in
        one step -> MXU M = B*N; set to 1 on v7x to shard across both TCs).
    """
    # TODO(synk): src_mask path not implemented (module default is None in nnU-Net).
    assert src_mask is None
    wqkv, bqkv, wo, bo = params
    B, N, D = query.shape
    assert D % nhead == 0
    d_k = D // nhead

    # Flatten to (B*N, D): lane-dense 2-D blocks and MXU M = B*N on the
    # projections; per-batch reductions slice rows inside the kernels.
    q2 = query.reshape(B * N, D)
    # NOTE: object-identity dispatch -> semantically-equal-but-distinct arrays
    # fall to the (slightly slower) 3-input cross path; still correct.
    is_self = (query is key) and (key is value)
    k2 = q2 if is_self else key.reshape(B * N, D)
    v2 = q2 if is_self else value.reshape(B * N, D)

    use_tiled = (token_block is not None) and (N > token_block)

    if not use_tiled:
        # ---------------- fused path: whole batch, single grid step ----------
        bb = B if batch_block is None else batch_block
        assert B % bb == 0
        M = bb * N
        act_spec = pl.BlockSpec((M, D), lambda i: (i, 0))
        const = lambda shape: pl.BlockSpec(shape, lambda i: (0, 0))
        weight_specs = [const(wqkv.shape), const(bqkv.shape),
                        const(wo.shape), const(bo.shape)]
        cp = pltpu.CompilerParams(dimension_semantics=("parallel",))
        out2_shape = jax.ShapeDtypeStruct((B * N, D), query.dtype)

        if is_self:
            kern = functools.partial(_fused_self_kernel, bb=bb, n_tok=N, d_k=d_k)
            out2 = pl.pallas_call(
                kern, out_shape=out2_shape, grid=(B // bb,),
                in_specs=[act_spec] + weight_specs, out_specs=act_spec,
                compiler_params=cp)(q2, wqkv, bqkv, wo, bo)
        else:
            kern = functools.partial(_fused_cross_kernel, bb=bb, n_tok=N, d_k=d_k)
            out2 = pl.pallas_call(
                kern, out_shape=out2_shape, grid=(B // bb,),
                in_specs=[act_spec, act_spec, act_spec] + weight_specs,
                out_specs=act_spec,
                compiler_params=cp)(q2, k2, v2, wqkv, bqkv, wo, bo)
        return out2.reshape(B, N, D)

    # ------------------- token-tiled path (large N / v7x) --------------------
    assert N % token_block == 0 and token_block % 8 == 0
    nt = N // token_block
    act_spec = pl.BlockSpec((token_block, D), lambda b, t: (b * nt + t, 0))
    const = lambda shape: pl.BlockSpec(shape, lambda b, t: (0, 0))
    fold_spec = pl.BlockSpec((D, D), lambda b, t: (b, 0))

    # Pass 1: folded per-batch context ((ctx * head_mask) @ Wo), bf16 (tiny).
    fold = pl.pallas_call(
        functools.partial(_ctx_tiled_kernel, d_k=d_k),
        out_shape=jax.ShapeDtypeStruct((B * D, D), jnp.bfloat16),
        grid=(B, nt),
        in_specs=[act_spec, act_spec, const(wqkv.shape), const(bqkv.shape),
                  const(wo.shape)],
        out_specs=fold_spec,
        scratch_shapes=[pltpu.VMEM((D, 1), jnp.float32),   # running col max
                        pltpu.VMEM((D, 1), jnp.float32),   # running exp-sum
                        pltpu.VMEM((D, D), jnp.float32)],  # running ek^T v
        compiler_params=pltpu.CompilerParams(
            dimension_semantics=("parallel", "arbitrary")),
    )(k2, v2, wqkv, bqkv, wo)

    # Pass 2: q tiles against the resident folded context.
    out2 = pl.pallas_call(
        functools.partial(_out_tiled_kernel, d_k=d_k),
        out_shape=jax.ShapeDtypeStruct((B * N, D), query.dtype),
        grid=(B, nt),
        in_specs=[act_spec, fold_spec, const(wqkv.shape), const(bqkv.shape),
                  const(bo.shape)],
        out_specs=act_spec,
        compiler_params=pltpu.CompilerParams(
            dimension_semantics=("parallel", "parallel")),
    )(q2, fold, wqkv, bqkv, bo)
    return out2.reshape(B, N, D)


# ------------------------------ parameter setup -------------------------------

def init_params(key, d_model):
    """nn.Linear-style init (U(-1/sqrt(fan_in), +1/sqrt(fan_in))).
    Wq|Wk|Wv packed into one (D, 3D) matrix; weights stored bf16 (halves weight
    DMA / VMEM), biases kept f32."""
    kq, kk, kv, ko = jax.random.split(key, 4)
    bound = 1.0 / math.sqrt(d_model)

    def linear(k):
        kw, kb = jax.random.split(k)
        w = jax.random.uniform(kw, (d_model, d_model), jnp.float32, -bound, bound)
        b = jax.random.uniform(kb, (1, d_model), jnp.float32, -bound, bound)
        return w, b

    wq, bq = linear(kq)
    wk, bk = linear(kk)
    wv, bv = linear(kv)
    wo, bo = linear(ko)
    wqkv = jnp.concatenate([wq, wk, wv], axis=1).astype(jnp.bfloat16)     # (D, 3D)
    bqkv = jnp.concatenate([bq, bk, bv], axis=1)                          # (1, 3D) f32
    return wqkv, bqkv, wo.astype(jnp.bfloat16), bo


# ----------------------------- pure-JAX reference ------------------------------

def reference_mha(query, key, value, params, nhead):
    wqkv, bqkv, wo, bo = params
    wqkv = wqkv.astype(jnp.float32)
    wo = wo.astype(jnp.float32)
    B, N, D = query.shape
    d_k = D // nhead

    def proj(x, w, b):
        return (x @ w + b).reshape(B, N, nhead, d_k).transpose(0, 2, 1, 3)

    q = proj(query, wqkv[:, :D], bqkv[:, :D])
    k = proj(key, wqkv[:, D:2 * D], bqkv[:, D:2 * D])
    v = proj(value, wqkv[:, 2 * D:], bqkv[:, 2 * D:])
    q = jax.nn.softmax(q, axis=-1) / math.sqrt(d_k)
    k = jax.nn.softmax(k, axis=-2)
    ctx = jnp.einsum('bhnd,bhne->bhde', k, v)
    o = jnp.einsum('bhnd,bhde->bhne', q, ctx)
    o = o.transpose(0, 2, 1, 3).reshape(B, N, D)
    return o @ wo + bo


# ----------------------------------- main --------------------------------------

if __name__ == "__main__":
    # Lane-dense sizes: N and d_model are multiples of the (8, 128) tile.
    B, N, d_model, nhead = 2, 128, 128, 4
    key = jax.random.PRNGKey(0)
    kp, kx, kq, kk, kv, kb = jax.random.split(key, 6)
    params = init_params(kp, d_model)

    # --- fused self-attention path (query is key is value), M = B*N = 256 ----
    x = jax.random.normal(kx, (B, N, d_model), jnp.float32)
    out_self = jax.block_until_ready(multih_attention(x, x, x, params, nhead))
    ref_self = reference_mha(x, x, x, params, nhead)
    assert out_self.shape == (B, N, d_model), out_self.shape
    err_self = float(jnp.max(jnp.abs(out_self - ref_self)))
    assert err_self < 1e-2, f"self-attention mismatch vs reference: {err_self}"

    # --- fused general path (distinct q / k / v) ------------------------------
    q_in = jax.random.normal(kq, (B, N, d_model), jnp.float32)
    k_in = jax.random.normal(kk, (B, N, d_model), jnp.float32)
    v_in = jax.random.normal(kv, (B, N, d_model), jnp.float32)
    out_gen = jax.block_until_ready(multih_attention(q_in, k_in, v_in, params, nhead))
    ref_gen = reference_mha(q_in, k_in, v_in, params, nhead)
    err_gen = float(jnp.max(jnp.abs(out_gen - ref_gen)))
    assert err_gen < 1e-2, f"cross-attention mismatch vs reference: {err_gen}"

    # --- token-tiled path (large-N / v7x VMEM-fit): N=512, 256-token tiles ----
    N_big = 512
    x_big = jax.random.normal(kb, (B, N_big, d_model), jnp.float32)
    out_big = jax.block_until_ready(
        multih_attention(x_big, x_big, x_big, params, nhead, token_block=256))
    ref_big = reference_mha(x_big, x_big, x_big, params, nhead)
    err_big = float(jnp.max(jnp.abs(out_big - ref_big)))
    assert err_big < 1e-2, f"tiled-path mismatch vs reference: {err_big}"

    print("KERNEL_OK")
</pallas_src>

<mosaic_0001>
module attributes {stable_mosaic.version = 11 : i64} {
  func.func @_fused_self_kernel(%arg0: i32, %arg1: memref<256x128xf32, #tpu.memory_space<vmem>>, %arg2: memref<128x384xbf16, #tpu.memory_space<vmem>>, %arg3: memref<1x384xf32, #tpu.memory_space<vmem>>, %arg4: memref<128x128xbf16, #tpu.memory_space<vmem>>, %arg5: memref<1x128xf32, #tpu.memory_space<vmem>>, %arg6: memref<256x128xf32, #tpu.memory_space<vmem>>) attributes {dimension_semantics = [#tpu.dimension_semantics<parallel>], iteration_bounds = array<i64: 1>, scalar_prefetch = 0 : i64, scratch_operands = 0 : i64, tpu.core_type = #tpu.core_type<tc>, window_params = [{transform_indices = @transform_0, window_bounds = array<i64: 256, 128>}, {pipeline_mode = #tpu.pipeline_mode<synchronous>, transform_indices = @transform_1, window_bounds = array<i64: 128, 384>}, {pipeline_mode = #tpu.pipeline_mode<synchronous>, transform_indices = @transform_2, window_bounds = array<i64: 1, 384>}, {pipeline_mode = #tpu.pipeline_mode<synchronous>, transform_indices = @transform_3, window_bounds = array<i64: 128, 128>}, {pipeline_mode = #tpu.pipeline_mode<synchronous>, transform_indices = @transform_4, window_bounds = array<i64: 1, 128>}, {transform_indices = @transform_5, window_bounds = array<i64: 256, 128>}]} {
    %c0 = arith.constant 0 : index
    %c0_0 = arith.constant 0 : index
    %0 = vector.load %arg1[%c0, %c0_0] : memref<256x128xf32, #tpu.memory_space<vmem>>, vector<256x128xf32>
    %1 = arith.truncf %0 : vector<256x128xf32> to vector<256x128xbf16>
    %2 = tpu.iota {dimensions = array<i32: 0>} : vector<128x128xi32>
    %3 = arith.sitofp %2 : vector<128x128xi32> to vector<128x128xf32>
    %4 = tpu.iota {dimensions = array<i32: 1>} : vector<128x128xi32>
    %5 = arith.sitofp %4 : vector<128x128xi32> to vector<128x128xf32>
    %cst = arith.constant 5.000000e-01 : f32
    %6 = vector.broadcast %cst : f32 to vector<128x128xf32>
    %7 = arith.addf %3, %6 : vector<128x128xf32>
    %cst_1 = arith.constant 3.125000e-02 : f32
    %8 = vector.broadcast %cst_1 : f32 to vector<128x128xf32>
    %9 = arith.mulf %7, %8 : vector<128x128xf32>
    %10 = math.floor %9 : vector<128x128xf32>
    %cst_2 = arith.constant 5.000000e-01 : f32
    %11 = vector.broadcast %cst_2 : f32 to vector<128x128xf32>
    %12 = arith.addf %5, %11 : vector<128x128xf32>
    %cst_3 = arith.constant 3.125000e-02 : f32
    %13 = vector.broadcast %cst_3 : f32 to vector<128x128xf32>
    %14 = arith.mulf %12, %13 : vector<128x128xf32>
    %15 = math.floor %14 : vector<128x128xf32>
    %16 = arith.cmpf oeq, %10, %15 : vector<128x128xf32>
    %17 = arith.extui %16 : vector<128x128xi1> to vector<128x128xi32>
    %18 = arith.sitofp %17 : vector<128x128xi32> to vector<128x128xf32>
    %19 = arith.truncf %18 : vector<128x128xf32> to vector<128x128xbf16>
    %c0_4 = arith.constant 0 : index
    %c0_5 = arith.constant 0 : index
    %20 = vector.load %arg2[%c0_4, %c0_5] : memref<128x384xbf16, #tpu.memory_space<vmem>>, vector<128x128xbf16>
    %cst_6 = arith.constant dense<0.000000e+00> : vector<256x128xf32>
    %21 = tpu.matmul %1, %20, %cst_6 {dimension_numbers = #tpu.dot_dimension_numbers<[1], [0], [0], [1], [0, 0, 1, 1], [], []>} : vector<256x128xbf16>, vector<128x128xbf16>, vector<256x128xf32> -> vector<256x128xf32>
    %c0_7 = arith.constant 0 : index
    %c0_8 = arith.constant 0 : index
    %22 = vector.load %arg3[%c0_7, %c0_8] : memref<1x384xf32, #tpu.memory_space<vmem>>, vector<1x128xf32>
    %23 = vector.broadcast %22 : vector<1x128xf32> to vector<256x128xf32>
    %24 = arith.addf %21, %23 : vector<256x128xf32>
    %cst_9 = arith.constant dense<0xFF800000> : vector<256xf32>
    %25 = vector.multi_reduction <maximumf>, %24, %cst_9 [1] : vector<256x128xf32> to vector<256xf32>
    %26 = vector.shape_cast %25 : vector<256xf32> to vector<256x1xf32>
    %27 = vector.broadcast %26 : vector<256x1xf32> to vector<256x128xf32>
    %28 = arith.subf %24, %27 : vector<256x128xf32>
    %29 = math.exp %28 : vector<256x128xf32>
    %30 = arith.truncf %29 : vector<256x128xf32> to vector<256x128xbf16>
    %cst_10 = arith.constant dense<0.000000e+00> : vector<256x128xf32>
    %31 = tpu.matmul %30, %19, %cst_10 {dimension_numbers = #tpu.dot_dimension_numbers<[1], [0], [0], [1], [0, 0, 1, 1], [], []>} : vector<256x128xbf16>, vector<128x128xbf16>, vector<256x128xf32> -> vector<256x128xf32>
    %32 = tpu.reciprocal %31 {approx = true} : vector<256x128xf32> -> vector<256x128xf32>
    %cst_11 = arith.constant 0.176776692 : f32
    %33 = vector.broadcast %cst_11 : f32 to vector<256x128xf32>
    %34 = arith.mulf %32, %33 : vector<256x128xf32>
    %35 = arith.mulf %29, %34 : vector<256x128xf32>
    %c0_12 = arith.constant 0 : index
    %c128 = arith.constant 128 : index
    %36 = vector.load %arg2[%c0_12, %c128] : memref<128x384xbf16, #tpu.memory_space<vmem>>, vector<128x128xbf16>
    %cst_13 = arith.constant dense<0.000000e+00> : vector<256x128xf32>
    %37 = tpu.matmul %1, %36, %cst_13 {dimension_numbers = #tpu.dot_dimension_numbers<[1], [0], [0], [1], [0, 0, 1, 1], [], []>} : vector<256x128xbf16>, vector<128x128xbf16>, vector<256x128xf32> -> vector<256x128xf32>
    %c0_14 = arith.constant 0 : index
    %c128_15 = arith.constant 128 : index
    %38 = vector.load %arg3[%c0_14, %c128_15] : memref<1x384xf32, #tpu.memory_space<vmem>>, vector<1x128xf32>
    %39 = vector.broadcast %38 : vector<1x128xf32> to vector<256x128xf32>
    %40 = arith.addf %37, %39 : vector<256x128xf32>
    %c0_16 = arith.constant 0 : index
    %c256 = arith.constant 256 : index
    %41 = vector.load %arg2[%c0_16, %c256] : memref<128x384xbf16, #tpu.memory_space<vmem>>, vector<128x128xbf16>
    %cst_17 = arith.constant dense<0.000000e+00> : vector<256x128xf32>
    %42 = tpu.matmul %1, %41, %cst_17 {dimension_numbers = #tpu.dot_dimension_numbers<[1], [0], [0], [1], [0, 0, 1, 1], [], []>} : vector<256x128xbf16>, vector<128x128xbf16>, vector<256x128xf32> -> vector<256x128xf32>
    %c0_18 = arith.constant 0 : index
    %c256_19 = arith.constant 256 : index
    %43 = vector.load %arg3[%c0_18, %c256_19] : memref<1x384xf32, #tpu.memory_space<vmem>>, vector<1x128xf32>
    %44 = vector.broadcast %43 : vector<1x128xf32> to vector<256x128xf32>
    %45 = arith.addf %42, %44 : vector<256x128xf32>
    %46 = arith.truncf %45 : vector<256x128xf32> to vector<256x128xbf16>
    %cst_20 = arith.constant 1.000000e+00 : bf16
    %47 = vector.broadcast %cst_20 : bf16 to vector<1x128xbf16>
    %c0_21 = arith.constant 0 : index
    %c0_22 = arith.constant 0 : index
    %48 = vector.load %arg4[%c0_21, %c0_22] : memref<128x128xbf16, #tpu.memory_space<vmem>>, vector<128x128xbf16>
    %c0_23 = arith.constant 0 : index
    %c0_24 = arith.constant 0 : index
    %49 = vector.load %arg5[%c0_23, %c0_24] : memref<1x128xf32, #tpu.memory_space<vmem>>, vector<1x128xf32>
    %50 = vector.extract_strided_slice %40 {offsets = [0, 0], sizes = [128, 128], strides = [1, 1]} : vector<256x128xf32> to vector<128x128xf32>
    %cst_25 = arith.constant dense<0xFF800000> : vector<128xf32>
    %51 = vector.multi_reduction <maximumf>, %50, %cst_25 [0] : vector<128x128xf32> to vector<128xf32>
    %52 = vector.shape_cast %51 : vector<128xf32> to vector<1x128xf32>
    %53 = vector.broadcast %52 : vector<1x128xf32> to vector<128x128xf32>
    %54 = arith.subf %50, %53 : vector<128x128xf32>
    %55 = math.exp %54 : vector<128x128xf32>
    %56 = arith.truncf %55 : vector<128x128xf32> to vector<128x128xbf16>
    %cst_26 = arith.constant dense<0.000000e+00> : vector<1x128xf32>
    %57 = tpu.matmul %47, %56, %cst_26 {dimension_numbers = #tpu.dot_dimension_numbers<[1], [0], [0], [1], [0, 0, 1, 1], [], []>} : vector<1x128xbf16>, vector<128x128xbf16>, vector<1x128xf32> -> vector<1x128xf32>
    %58 = vector.extract_strided_slice %46 {offsets = [0, 0], sizes = [128, 128], strides = [1, 1]} : vector<256x128xbf16> to vector<128x128xbf16>
    %cst_27 = arith.constant dense<0.000000e+00> : vector<128x128xf32>
    %59 = tpu.matmul %56, %58, %cst_27 {dimension_numbers = #tpu.dot_dimension_numbers<[0], [0], [1], [1], [0, 1, 1, 1], [], []>} : vector<128x128xbf16>, vector<128x128xbf16>, vector<128x128xf32> -> vector<128x128xf32>
    %cst_28 = arith.constant 0.000000e+00 : f32
    %60 = vector.broadcast %cst_28 : f32 to vector<128x128xf32>
    %61 = arith.select %16, %59, %60 : vector<128x128xi1>, vector<128x128xf32>
    %62 = arith.truncf %61 : vector<128x128xf32> to vector<128x128xbf16>
    %cst_29 = arith.constant dense<0.000000e+00> : vector<128x128xf32>
    %63 = tpu.matmul %62, %48, %cst_29 {dimension_numbers = #tpu.dot_dimension_numbers<[1], [0], [0], [1], [0, 0, 1, 1], [], []>} : vector<128x128xbf16>, vector<128x128xbf16>, vector<128x128xf32> -> vector<128x128xf32>
    %64 = arith.truncf %63 : vector<128x128xf32> to vector<128x128xbf16>
    %65 = vector.extract_strided_slice %35 {offsets = [0, 0], sizes = [128, 128], strides = [1, 1]} : vector<256x128xf32> to vector<128x128xf32>
    %66 = tpu.reciprocal %57 {approx = true} : vector<1x128xf32> -> vector<1x128xf32>
    %67 = vector.broadcast %66 : vector<1x128xf32> to vector<128x128xf32>
    %68 = arith.mulf %65, %67 : vector<128x128xf32>
    %69 = arith.truncf %68 : vector<128x128xf32> to vector<128x128xbf16>
    %cst_30 = arith.constant dense<0.000000e+00> : vector<128x128xf32>
    %70 = tpu.matmul %69, %64, %cst_30 {dimension_numbers = #tpu.dot_dimension_numbers<[1], [0], [0], [1], [0, 0, 1, 1], [], []>} : vector<128x128xbf16>, vector<128x128xbf16>, vector<128x128xf32> -> vector<128x128xf32>
    %71 = vector.broadcast %49 : vector<1x128xf32> to vector<128x128xf32>
    %72 = arith.addf %70, %71 : vector<128x128xf32>
    %c0_31 = arith.constant 0 : index
    %c0_32 = arith.constant 0 : index
    %73 = vector.load %arg6[%c0_31, %c0_32] : memref<256x128xf32, #tpu.memory_space<vmem>>, vector<128x128xf32>
    tpu.vector_store %arg6[%c0_31, %c0_32], %72 {strides = array<i32>} : memref<256x128xf32, #tpu.memory_space<vmem>>, vector<128x128xf32>,
    %74 = vector.extract_strided_slice %40 {offsets = [128, 0], sizes = [128, 128], strides = [1, 1]} : vector<256x128xf32> to vector<128x128xf32>
    %cst_33 = arith.constant dense<0xFF800000> : vector<128xf32>
    %75 = vector.multi_reduction <maximumf>, %74, %cst_33 [0] : vector<128x128xf32> to vector<128xf32>
    %76 = vector.shape_cast %75 : vector<128xf32> to vector<1x128xf32>
    %77 = vector.broadcast %76 : vector<1x128xf32> to vector<128x128xf32>
    %78 = arith.subf %74, %77 : vector<128x128xf32>
    %79 = math.exp %78 : vector<128x128xf32>
    %80 = arith.truncf %79 : vector<128x128xf32> to vector<128x128xbf16>
    %cst_34 = arith.constant dense<0.000000e+00> : vector<1x128xf32>
    %81 = tpu.matmul %47, %80, %cst_34 {dimension_numbers = #tpu.dot_dimension_numbers<[1], [0], [0], [1], [0, 0, 1, 1], [], []>} : vector<1x128xbf16>, vector<128x128xbf16>, vector<1x128xf32> -> vector<1x128xf32>
    %82 = vector.extract_strided_slice %46 {offsets = [128, 0], sizes = [128, 128], strides = [1, 1]} : vector<256x128xbf16> to vector<128x128xbf16>
    %cst_35 = arith.constant dense<0.000000e+00> : vector<128x128xf32>
    %83 = tpu.matmul %80, %82, %cst_35 {dimension_numbers = #tpu.dot_dimension_numbers<[0], [0], [1], [1], [0, 1, 1, 1], [], []>} : vector<128x128xbf16>, vector<128x128xbf16>, vector<128x128xf32> -> vector<128x128xf32>
    %cst_36 = arith.constant 0.000000e+00 : f32
    %84 = vector.broadcast %cst_36 : f32 to vector<128x128xf32>
    %85 = arith.select %16, %83, %84 : vector<128x128xi1>, vector<128x128xf32>
    %86 = arith.truncf %85 : vector<128x128xf32> to vector<128x128xbf16>
    %cst_37 = arith.constant dense<0.000000e+00> : vector<128x128xf32>
    %87 = tpu.matmul %86, %48, %cst_37 {dimension_numbers = #tpu.dot_dimension_numbers<[1], [0], [0], [1], [0, 0, 1, 1], [], []>} : vector<128x128xbf16>, vector<128x128xbf16>, vector<128x128xf32> -> vector<128x128xf32>
    %88 = arith.truncf %87 : vector<128x128xf32> to vector<128x128xbf16>
    %89 = vector.extract_strided_slice %35 {offsets = [128, 0], sizes = [128, 128], strides = [1, 1]} : vector<256x128xf32> to vector<128x128xf32>
    %90 = tpu.reciprocal %81 {approx = true} : vector<1x128xf32> -> vector<1x128xf32>
    %91 = vector.broadcast %90 : vector<1x128xf32> to vector<128x128xf32>
    %92 = arith.mulf %89, %91 : vector<128x128xf32>
    %93 = arith.truncf %92 : vector<128x128xf32> to vector<128x128xbf16>
    %cst_38 = arith.constant dense<0.000000e+00> : vector<128x128xf32>
    %94 = tpu.matmul %93, %88, %cst_38 {dimension_numbers = #tpu.dot_dimension_numbers<[1], [0], [0], [1], [0, 0, 1, 1], [], []>} : vector<128x128xbf16>, vector<128x128xbf16>, vector<128x128xf32> -> vector<128x128xf32>
    %95 = vector.broadcast %49 : vector<1x128xf32> to vector<128x128xf32>
    %96 = arith.addf %94, %95 : vector<128x128xf32>
    %c128_39 = arith.constant 128 : index
    %c0_40 = arith.constant 0 : index
    %97 = vector.load %arg6[%c128_39, %c0_40] : memref<256x128xf32, #tpu.memory_space<vmem>>, vector<128x128xf32>
    tpu.vector_store %arg6[%c128_39, %c0_40], %96 {strides = array<i32>} : memref<256x128xf32, #tpu.memory_space<vmem>>, vector<128x128xf32>,
    return
  }
  func.func @transform_0(%arg0: i32) -> (i32, i32) {
    %c0_i32 = arith.constant 0 : i32
    %c0_i32_0 = arith.constant 0 : i32
    return %arg0, %c0_i32 : i32, i32
  }
  func.func @transform_1(%arg0: i32) -> (i32, i32) {
    %c0_i32 = arith.constant 0 : i32
    %c0_i32_0 = arith.constant 0 : i32
    %c0_i32_1 = arith.constant 0 : i32
    return %c0_i32, %c0_i32_0 : i32, i32
  }
  func.func @transform_2(%arg0: i32) -> (i32, i32) {
    %c0_i32 = arith.constant 0 : i32
    %c0_i32_0 = arith.constant 0 : i32
    %c0_i32_1 = arith.constant 0 : i32
    return %c0_i32, %c0_i32_0 : i32, i32
  }
  func.func @transform_3(%arg0: i32) -> (i32, i32) {
    %c0_i32 = arith.constant 0 : i32
    %c0_i32_0 = arith.constant 0 : i32
    %c0_i32_1 = arith.constant 0 : i32
    return %c0_i32, %c0_i32_0 : i32, i32
  }
  func.func @transform_4(%arg0: i32) -> (i32, i32) {
    %c0_i32 = arith.constant 0 : i32
    %c0_i32_0 = arith.constant 0 : i32
    %c0_i32_1 = arith.constant 0 : i32
    return %c0_i32, %c0_i32_0 : i32, i32
  }
  func.func @transform_5(%arg0: i32) -> (i32, i32) {
    %c0_i32 = arith.constant 0 : i32
    %c0_i32_0 = arith.constant 0 : i32
    return %arg0, %c0_i32 : i32, i32
  }
}

</mosaic_0001>

<bundles_post_ra>
// kernel: tpu_custom_call.1
= control target key start
LH: loop header
LB: loop body
LE: loop exit
PB: predicated region body
PF: predicated region fallthrough
CT: control target
= control target key end

     0   :  { %10 = vsyncpa [#allocation3], 0  ;;  %s4764_s0 = inlined_call_operand.hbm [shape: f32[256,128], index: 0, kind: input, shape index: {}]   ;;  %s4765_s1 = inlined_call_operand.hbm [shape: bf16[128,384], index: 1, kind: input, shape index: {}]   ;;  %s4766_s2 = inlined_call_operand.vmem [shape: f32[1,384], index: 2, kind: input, shape index: {}]   ;;  %s4767_s3 = inlined_call_operand.hbm [shape: bf16[128,128], index: 3, kind: input, shape index: {}]   ;;  %s4768_s4 = inlined_call_operand.vmem [shape: f32[1,128], index: 4, kind: input, shape index: {}]   ;;  %s4769_s5 = inlined_call_operand.hbm [shape: f32[256,128], index: 5, kind: output, shape index: {}]  }
   0x1   :  { %11 = vsyncpa [#allocation6], 0 }
   0x2   :  { %12 = vsyncpa [#allocation4], 0  ;;  %s3569_s18 = smov [#allocation5]  }
   0x3   :  { %s30_s19 = sshll.u32 %s3569_s18, 4  ;;  %s31_s19 = int_to_ptr.vmem [resolvable:$true] %s30_s19 }
   0x4   :  { %s3491_s20 = scalar_lea.vmem %s31_s19, 3072  ;;  %p3496_p1 = scmp.lt.s32.totalorder %s31_s19, %s31_s19 }
   0x5   :  { %p3492_p0 = scmp.ne.s32.totalorder %s31_s19, %s3491_s20  ;;  %p3497_p2 = scmp.lt.s32.totalorder %s3491_s20, %s3491_s20 }
   0x7   :  { %p3498_p3 = por %p3497_p2, %p3496_p1 }
   0x9   :  { %p3499_p4 = pnand %p3498_p3, %p3492_p0 }
   0xb   :  { %3502 = shalt.err (!%p3499_p4)
}
   0xc   :  { %s3570_s21 = smov 192   ;;  %s3571_s22 = smov 12  }
   0xd   :  { %36 = dma.hbm_to_vmem [thread:$0]  %s4765_s1, 3072, %s31_s19, [#allocation6], %s3570_s21, %s3570_s21, %s3571_s22  }
   0xe   :  { %s3572_s25 = smov [#allocation2]  }
   0xf   :  { %s18_s26 = sshll.u32 %s3572_s25, 4  ;;  %s19_s26 = int_to_ptr.vmem [resolvable:$true] %s18_s26 }
  0x10   :  { %s3511_s27 = scalar_lea.vmem %s19_s26, 4096  ;;  %p3516_p6 = scmp.lt.s32.totalorder %s19_s26, %s19_s26 }
  0x11   :  { %p3512_p5 = scmp.ne.s32.totalorder %s19_s26, %s3511_s27  ;;  %p3517_p7 = scmp.lt.s32.totalorder %s3511_s27, %s3511_s27 }
  0x13   :  { %p3518_p8 = por %p3517_p7, %p3516_p6 }
  0x15   :  { %p3519_p9 = pnand %p3518_p8, %p3512_p5 }
  0x17   :  { %3522 = shalt.err (!%p3519_p9)
}
  0x18   :  { %s3573_s28 = smov 128   ;;  %s3574_s29 = smov 8  }
  0x19   :  { %24 = dma.hbm_to_vmem [thread:$0]  %s4764_s0, 4096, %s19_s26, [#allocation3], %s3573_s28, %s3573_s28, %s3574_s29  }
  0x1a   :  { %s3575_s1 = smov [#allocation7]  }
  0x1b   :  { %s44_s7 = sshll.u32 %s3575_s1, 4  ;;  %s45_s7 = int_to_ptr.vmem [resolvable:$true] %s44_s7 }
  0x1c   :  { %s3531_s8 = scalar_lea.vmem %s45_s7, 1024  ;;  %p3536_p11 = scmp.lt.s32.totalorder %s45_s7, %s45_s7 }
  0x1d   :  { %p3532_p10 = scmp.ne.s32.totalorder %s45_s7, %s3531_s8  ;;  %p3537_p12 = scmp.lt.s32.totalorder %s3531_s8, %s3531_s8 }
  0x1f   :  { %p3538_p13 = por %p3537_p12, %p3536_p11 }
  0x21   :  { %p3539_p0 = pnand %p3538_p13, %p3532_p10 }
  0x23   :  { %3542 = shalt.err (!%p3539_p0)
}
  0x24   :  { %s3576_s9 = smov 64   ;;  %s3577_s10 = smov 4  }
  0x25   :  { %50 = dma.hbm_to_vmem [thread:$0]  %s4767_s3, 1024, %s45_s7, [#allocation6], %s3576_s9, %s3576_s9, %s3577_s10  }
  0x26   :  { %3563 = dma.done.wait [#allocation3], 4096  }
  0x27   :  { %3564 = vsyncadd [#allocation3], 4294963200 }
  0x28   :  { %3565 = dma.done.wait [#allocation6], 4096  }
  0x29   :  { %3566 = vsyncadd [#allocation6], 4294963200  ;;  %v3255_v0 = vld [vmem:[#allocation5 + $0xa8] ss:$12 sps:$4 sm:$0xff]   ;;  %v3256_v1 = vld [vmem:[#allocation5 + $0x90] ss:$12 sps:$4 sm:$0xff]  }
  0x2a   :  { %2817 = vmatprep.subr.bf16.mxu0 %v3255_v0  ;;  %v3257_v2 = vld [vmem:[#allocation5 + $0x78] ss:$12 sps:$4 sm:$0xff]   ;;  %v3258_v3 = vld [vmem:[#allocation5 + $0x60] ss:$12 sps:$4 sm:$0xff]   ;;  %v3259_v7 = vld [vmem:[#allocation5 + $0x48] ss:$12 sps:$4 sm:$0xff]  }
  0x2b   :  { %2818 = vmatpush3.bf16.msra.mxu0 %v3255_v0  ;;  %v64_v4 = vld [vmem:[#allocation2] sm:$0xff]  ;;  %v65_v5 = vld [vmem:[#allocation2 + $0x8] sm:$0xff]  ;;  %v3260_v8 = vld [vmem:[#allocation5 + $0x30] ss:$12 sps:$4 sm:$0xff]   ;;  %v112_v0 = vlaneseq }
  0x2c   :  { %2819 = vmatprep.subr.bf16.mxu0 %v3256_v1  ;;  %v3625_v6 = vpack.c.bf16 %v65_v5, %v64_v4  ;;  %v3261_v9 = vld [vmem:[#allocation5 + $0x18] ss:$12 sps:$4 sm:$0xff]   ;;  %v3262_v10 = vld [vmem:[#allocation5] ss:$12 sps:$4 sm:$0xff]   ;;  %v66_v11 = vld [vmem:[#allocation2 + $0x10] sm:$0xff] }
  0x2d   :  { %v67_v12 = vld [vmem:[#allocation2 + $0x18] sm:$0xff]  ;;  %v68_v13 = vld [vmem:[#allocation2 + $0x20] sm:$0xff]  ;;  %v69_v14 = vld [vmem:[#allocation2 + $0x28] sm:$0xff] }
  0x2e   :  { %4849 = vst [vmem:[#allocation12_spill] sm:$0xff] %v3625_v6  ;;  %2833 = vmatprep.mubr.bf16.mxu0 %v3625_v6  ;;  %v3263_v15 = vld [vmem:[#allocation5 + $0xac] ss:$12 sps:$4 sm:$0xff]   ;;  %v3628_v16 = vpack.c.bf16 %v67_v12, %v66_v11  ;;  %v3264_v17 = vld [vmem:[#allocation5 + $0x94] ss:$12 sps:$4 sm:$0xff]   ;;  %v3630_v18 = vpack.c.bf16 %v69_v14, %v68_v13 }
  0x2f   :  { %2820 = vmatpush3.bf16.msra.mxu0 %v3256_v1  ;;  %v70_v19 = vld [vmem:[#allocation2 + $0x30] sm:$0xff]  ;;  %v71_v20 = vld [vmem:[#allocation2 + $0x38] sm:$0xff]  ;;  %v72_v21 = vld [vmem:[#allocation2 + $0x40] sm:$0xff]  ;;  %v4770_v1 = vmov 0.0  }
  0x30   :  { %2821 = vmatprep.subr.bf16.mxu0 %v3257_v2  ;;  %4850 = vst [vmem:[#allocation13_spill] sm:$0xff] %v3628_v16  ;;  %4851 = vst [vmem:[#allocation14_spill] sm:$0xff] %v3630_v18  ;;  %v73_v22 = vld [vmem:[#allocation2 + $0x48] sm:$0xff]  ;;  %v3634_v24 = vpack.c.bf16 %v71_v20, %v70_v19  ;;  %v3266_v26 = vld [vmem:[#allocation5 + $0x64] ss:$12 sps:$4 sm:$0xff]  }
  0x31   :  { %v3265_v23 = vld [vmem:[#allocation5 + $0x7c] ss:$12 sps:$4 sm:$0xff]   ;;  %v3636_v25 = vpack.c.bf16 %v73_v22, %v72_v21  ;;  %v74_v27 = vld [vmem:[#allocation2 + $0x50] sm:$0xff]  ;;  %v76_v29 = vld [vmem:[#allocation2 + $0x60] sm:$0xff] }
  0x32   :  { %4852 = vst [vmem:[#allocation15_spill] sm:$0xff] %v3634_v24  ;;  %v75_v28 = vld [vmem:[#allocation2 + $0x58] sm:$0xff]  ;;  %v77_v30 = vld [vmem:[#allocation2 + $0x68] sm:$0xff]  ;;  %v3268_v34 = vld [vmem:[#allocation5 + $0x34] ss:$12 sps:$4 sm:$0xff]  }
  0x33   :  { %2822 = vmatpush3.bf16.msra.mxu0 %v3257_v2  ;;  %4853 = vst [vmem:[#allocation16_spill] sm:$0xff] %v3636_v25  ;;  %v3267_v31 = vld [vmem:[#allocation5 + $0x4c] ss:$12 sps:$4 sm:$0xff]   ;;  %v3640_v32 = vpack.c.bf16 %v75_v28, %v74_v27  ;;  %v3642_v33 = vpack.c.bf16 %v77_v30, %v76_v29  ;;  %v78_v35 = vld [vmem:[#allocation2 + $0x70] sm:$0xff]  ;;  %v80_v37 = vld [vmem:[#allocation2 + $0x80] sm:$0xff]  ;;  %v3690_v2 = vshrl.u32 %v112_v0, 7 }
  0x34   :  { %2823 = vmatprep.subr.bf16.mxu0 %v3258_v3  ;;  %v79_v36 = vld [vmem:[#allocation2 + $0x78] sm:$0xff]  ;;  %v81_v38 = vld [vmem:[#allocation2 + $0x88] sm:$0xff]  ;;  %v3270_v42 = vld [vmem:[#allocation5 + $0x4] ss:$12 sps:$4 sm:$0xff]  }
  0x35   :  { %4854 = vst [vmem:[#allocation17_spill] sm:$0xff] %v3640_v32  ;;  %4855 = vst [vmem:[#allocation18_spill] sm:$0xff] %v3642_v33  ;;  %v3269_v39 = vld [vmem:[#allocation5 + $0x1c] ss:$12 sps:$4 sm:$0xff]   ;;  %v3646_v40 = vpack.c.bf16 %v79_v36, %v78_v35  ;;  %v3648_v41 = vpack.c.bf16 %v81_v38, %v80_v37  ;;  %v82_v43 = vld [vmem:[#allocation2 + $0x90] sm:$0xff]  ;;  %v127_v4 = vadd.s32 112, %v3690_v2 }
  0x36   :  { %v83_v44 = vld [vmem:[#allocation2 + $0x98] sm:$0xff]  ;;  %v84_v45 = vld [vmem:[#allocation2 + $0xa0] sm:$0xff]  ;;  %v85_v46 = vld [vmem:[#allocation2 + $0xa8] sm:$0xff]  ;;  %4865 = vst [vmem:[#allocation28_spill] sm:$0xff] %v3690_v2  ;;  %v128_v5 = vadd.s32 120, %v3690_v2  ;;  %v126_v19 = vadd.s32 104, %v3690_v2 }
  0x37   :  { %2824 = vmatpush3.bf16.msra.mxu0 %v3258_v3  ;;  %4856 = vst [vmem:[#allocation19_spill] sm:$0xff] %v3646_v40  ;;  %4857 = vst [vmem:[#allocation20_spill] sm:$0xff] %v3648_v41  ;;  %v3652_v47 = vpack.c.bf16 %v83_v44, %v82_v43  ;;  %v3654_v48 = vpack.c.bf16 %v85_v46, %v84_v45  ;;  %v86_v49 = vld [vmem:[#allocation2 + $0xb0] sm:$0xff]  ;;  %v87_v50 = vld [vmem:[#allocation2 + $0xb8] sm:$0xff]  ;;  %v146_v3 = vand.u32 127, %v112_v0  ;;  %v123_v37 = vadd.s32 80, %v3690_v2 }
  0x38   :  { %2825 = vmatprep.subr.bf16.mxu0 %v3259_v7  ;;  %v88_v51 = vld [vmem:[#allocation2 + $0xc0] sm:$0xff]  ;;  %v89_v52 = vld [vmem:[#allocation2 + $0xc8] sm:$0xff]  ;;  %v3658_v53 = vpack.c.bf16 %v87_v50, %v86_v49  ;;  %v90_v55 = vld [vmem:[#allocation2 + $0xd0] sm:$0xff]  ;;  %v142_v28 = vcvt.s32.f32 %v126_v19  ;;  %v124_v38 = vadd.s32 88, %v3690_v2  ;;  %v4866_v43 = vmov 0 }
  0x39   :  { %4858 = vst [vmem:[#allocation21_spill] sm:$0xff] %v3652_v47  ;;  %4859 = vst [vmem:[#allocation22_spill] sm:$0xff] %v3654_v48  ;;  %v3660_v54 = vpack.c.bf16 %v89_v52, %v88_v51  ;;  %v91_v56 = vld [vmem:[#allocation2 + $0xd8] sm:$0xff]  ;;  %v92_v57 = vld [vmem:[#allocation2 + $0xe0] sm:$0xff]  ;;  %v139_v46 = vcvt.s32.f32 %v123_v37  ;;  %v3579_v51 = vmov 1.0|1.0  }
  0x3a   :  { %4860 = vst [vmem:[#allocation23_spill] sm:$0xff] %v3658_v53  ;;  %v93_v58 = vld [vmem:[#allocation2 + $0xe8] sm:$0xff]  ;;  %v3664_v59 = vpack.c.bf16 %v91_v56, %v90_v55  ;;  %v94_v61 = vld [vmem:[#allocation2 + $0xf0] sm:$0xff]  ;;  %v95_v62 = vld [vmem:[#allocation2 + $0xf8] sm:$0xff]  ;;  %v161_v36 = vadd.f32 0.5, %v142_v28  ;;  %v140_v49 = vcvt.s32.f32 %v124_v38 }
  0x3b   :  { %2826 = vmatpush3.bf16.msra.mxu0 %v3259_v7  ;;  %4861 = vst [vmem:[#allocation24_spill] sm:$0xff] %v3660_v54  ;;  %v3666_v60 = vpack.c.bf16 %v93_v58, %v92_v57  ;;  %v3670_v63 = vpack.c.bf16 %v95_v62, %v94_v61  ;;  %v147_v7 = vcvt.s32.f32 %v146_v3  ;;  %v3697_v11 = vld [vmem:[%s4766_s2] ss:$0 sm:$0xff]  ;;  %v158_v57 = vadd.f32 0.5, %v139_v46 }
  0x3c   :  { %2827 = vmatprep.subr.bf16.mxu0 %v3260_v8  ;;  %4862 = vst [vmem:[#allocation25_spill] sm:$0xff] %v3664_v59  ;;  %v177_v45 = vmul.f32 0.03125, %v161_v36  ;;  %v159_v58 = vadd.f32 0.5, %v140_v49  ;;  %v121_v61 = vadd.s32 64, %v3690_v2  ;;  %v122_v62 = vadd.s32 72, %v3690_v2 }
  0x3d   :  { %4863 = vst [vmem:[#allocation26_spill] sm:$0xff] %v3666_v60  ;;  %4864 = vst [vmem:[#allocation27_spill] sm:$0xff] %v3670_v63  ;;  %v174_v3 = vmul.f32 0.03125, %v158_v57 }
  0x3e   :  { %v193_v56 = vfloor.f32 %v177_v45 }
  0x3f   :  { %2828 = vmatpush3.bf16.msra.mxu0 %v3260_v8  ;;  %v143_v8 = vcvt.s32.f32 %v127_v4  ;;  %v175_v4 = vmul.f32 0.03125, %v159_v58 }
  0x40   :  { %2829 = vmatprep.subr.bf16.mxu0 %v3261_v9 }
  0x41   :  { %v162_v12 = vadd.f32 0.5, %v143_v8  ;;  %v137_v8 = vcvt.s32.f32 %v121_v61  ;;  %v4875_v61 = vmov 0 }
  0x43   :  { %2830 = vmatpush3.bf16.msra.mxu0 %v3261_v9  ;;  %v144_v9 = vcvt.s32.f32 %v128_v5  ;;  %v178_v21 = vmul.f32 0.03125, %v162_v12  ;;  %v190_v12 = vfloor.f32 %v174_v3 }
  0x44   :  { %2831 = vmatprep.subr.bf16.mxu0 %v3262_v10 }
  0x45   :  { %v163_v13 = vadd.f32 0.5, %v144_v9  ;;  %v194_v30 = vfloor.f32 %v178_v21  ;;  %v138_v9 = vcvt.s32.f32 %v122_v62 }
  0x47   :  { %2832 = vmatpush3.bf16.msra.mxu0 %v3262_v10  ;;  %v196_v10 = vadd.f32 0.5, %v147_v7  ;;  %v179_v22 = vmul.f32 0.03125, %v163_v13  ;;  %v4869_v7 = vmov 0  ;;  %v191_v13 = vfloor.f32 %v175_v4 }
  0x48   :  { %2913 = vmatprep.subr.bf16.mxu0 %v3263_v15  ;;  %v157_v19 = vadd.f32 0.5, %v138_v9  ;;  %v116_v9 = vadd.s32 24, %v3690_v2 }
  0x49   :  { %v197_v14 = vmul.f32 0.03125, %v196_v10 }
  0x4a   :  { %2834 = vmatmul.mubr.bf16.vlgmr.msra.gmra.mxu0 %v3628_v16 }
  0x4b   :  { %2837 = vmatprep.mubr.bf16.mxu0 %v3630_v18  ;;  %2914 = vmatpush3.bf16.msra.mxu0 %v3263_v15 }
  0x4c   :  { %2915 = vmatprep.subr.bf16.mxu0 %v3264_v17 }
  0x4f   :  { %2916 = vmatpush3.bf16.msra.mxu0 %v3264_v17  ;;  %v125_v17 = vadd.s32 96, %v3690_v2 }
  0x50   :  { %2917 = vmatprep.subr.bf16.mxu0 %v3265_v23 }
  0x51   :  { %v141_v27 = vcvt.s32.f32 %v125_v17  ;;  %v156_v17 = vadd.f32 0.5, %v137_v8  ;;  %v115_v8 = vadd.s32 16, %v3690_v2 }
  0x52   :  { %2838 = vmatmul.mubr.bf16.gmra.mxu0 %v3634_v24 }
  0x53   :  { %2841 = vmatprep.mubr.bf16.mxu0 %v3636_v25  ;;  %2918 = vmatpush3.bf16.msra.mxu0 %v3265_v23  ;;  %v3704_v23 = vfloor.f32 %v197_v14  ;;  %v160_v35 = vadd.f32 0.5, %v141_v27  ;;  %v119_v14 = vadd.s32 48, %v3690_v2 }
  0x54   :  { %2919 = vmatprep.subr.bf16.mxu0 %v3266_v26 }
  0x55   :  { %vm213_vm0 = vcmp.eq.f32.partialorder %v194_v30, %v3704_v23  ;;  %v176_v44 = vmul.f32 0.03125, %v160_v35  ;;  %vm212_vm4 = vcmp.eq.f32.partialorder %v193_v56, %v3704_v23  ;;  %vm209_vm6 = vcmp.eq.f32.partialorder %v190_v12, %v3704_v23 }
  0x56   :  { %vm210_vm7 = vcmp.eq.f32.partialorder %v191_v13, %v3704_v23  ;;  %v4872_v30 = vmov 0 }
  0x57   :  { %2920 = vmatpush3.bf16.msra.mxu0 %v3266_v26  ;;  %v192_v55 = vfloor.f32 %v176_v44  ;;  %vm3761_vm8 = vmpackc.low %vm210_vm7, %vm209_vm6  ;;  %v117_v44 = vadd.s32 32, %v3690_v2 }
  0x58   :  { %2921 = vmatprep.subr.bf16.mxu0 %v3267_v31  ;;  %v4873_v30 = vsel %vm3761_vm8, 4294967295, %v4872_v30 }
  0x59   :  { %vm211_vm3 = vcmp.eq.f32.partialorder %v192_v55, %v3704_v23  ;;  %4874 = vst [vmem:[#allocation31_spill] sm:$0xff] %v4873_v30  ;;  %v118_v55 = vadd.s32 40, %v3690_v2  ;;  %v133_v57 = vcvt.s32.f32 %v117_v44 }
  0x5a   :  { %2842 = vmatmul.mubr.bf16.gmra.mxu0 %v3640_v32  ;;  %vm3740_vm5 = vmpackc.low %vm212_vm4, %vm211_vm3 }
  0x5b   :  { %2845 = vmatprep.mubr.bf16.mxu0 %v3642_v33  ;;  %2922 = vmatpush3.bf16.msra.mxu0 %v3267_v31  ;;  %v195_v31 = vfloor.f32 %v179_v22  ;;  %v4870_v7 = vsel %vm3740_vm5, 4294967295, %v4869_v7  ;;  %v135_v22 = vcvt.s32.f32 %v119_v14  ;;  %v134_v3 = vcvt.s32.f32 %v118_v55 }
  0x5c   :  { %2923 = vmatprep.subr.bf16.mxu0 %v3268_v34  ;;  %4871 = vst [vmem:[#allocation30_spill] sm:$0xff] %v4870_v7  ;;  %v152_v4 = vadd.f32 0.5, %v133_v57  ;;  %v129_v55 = vcvt.s32.f32 %v3690_v2 }
  0x5d   :  { %vm214_vm1 = vcmp.eq.f32.partialorder %v195_v31, %v3704_v23  ;;  %v172_v31 = vmul.f32 0.03125, %v156_v17  ;;  %v154_v36 = vadd.f32 0.5, %v135_v22  ;;  %v153_v13 = vadd.f32 0.5, %v134_v3 }
  0x5e   :  { %vm3718_vm2 = vmpackc.low %vm214_vm1, %vm213_vm0  ;;  %v168_v17 = vmul.f32 0.03125, %v152_v4  ;;  %v148_v4 = vadd.f32 0.5, %v129_v55 }
  0x5f   :  { %2924 = vmatpush3.bf16.msra.mxu0 %v3268_v34  ;;  %v4867_v43 = vsel %vm3718_vm2, 4294967295, %v4866_v43  ;;  %2865 = vmatprep.subr.msk.bf16.mxu1 %vm3718_vm2, %v3579_v51  ;;  %v188_v38 = vfloor.f32 %v172_v31  ;;  %v170_v49 = vmul.f32 0.03125, %v154_v36 }
  0x60   :  { %2925 = vmatprep.subr.bf16.mxu0 %v3269_v39  ;;  %4868 = vst [vmem:[#allocation29_spill] sm:$0xff] %v4867_v43  ;;  %2866 = vmatpush3.bf16.msk.msra.mxu1 %vm3718_vm2, %v3579_v51  ;;  %v184_v31 = vfloor.f32 %v168_v17  ;;  %v4884_v17 = vmov 0 }
  0x61   :  { %2867 = vmatprep.subr.msk.bf16.mxu1 %vm3740_vm5, %v3579_v51  ;;  %vm207_vm9 = vcmp.eq.f32.partialorder %v188_v38, %v3704_v23  ;;  %v186_v62 = vfloor.f32 %v170_v49 }
  0x62   :  { %2846 = vmatmul.mubr.bf16.gmra.mxu0 %v3646_v40  ;;  %vm203_vm15 = vcmp.eq.f32.partialorder %v184_v31, %v3704_v23 }
  0x63   :  { %2849 = vmatprep.mubr.bf16.mxu0 %v3648_v41  ;;  %2926 = vmatpush3.bf16.msra.mxu0 %v3269_v39  ;;  %vm205_vm12 = vcmp.eq.f32.partialorder %v186_v62, %v3704_v23 }
  0x64   :  { %2927 = vmatprep.subr.bf16.mxu0 %v3270_v42  ;;  %2868 = vmatpush3.bf16.msk.msra.mxu1 %vm3740_vm5, %v3579_v51 }
  0x65   :  { %2869 = vmatprep.subr.msk.bf16.mxu1 %vm3761_vm8, %v3579_v51 }
  0x67   :  { %2928 = vmatpush3.bf16.msra.mxu0 %v3270_v42 }
  0x68   :  { %3009 = vmatprep.subr.bf16.mxu0 %v4770_v1  ;;  %2870 = vmatpush3.bf16.msk.msra.mxu1 %vm3761_vm8, %v3579_v51 }
  0x6a   :  { %2850 = vmatmul.mubr.bf16.gmra.mxu0 %v3652_v47 }
  0x6b   :  { %2853 = vmatprep.mubr.bf16.mxu0 %v3654_v48 }
  0x72   :  { %2854 = vmatmul.mubr.bf16.gmra.mxu0 %v3658_v53 }
  0x73   :  { %2857 = vmatprep.mubr.bf16.mxu0 %v3660_v54 }
  0x7a   :  { %2858 = vmatmul.mubr.bf16.gmra.mxu0 %v3664_v59 }
  0x7b   :  { %2861 = vmatprep.mubr.bf16.mxu0 %v3666_v60 }
  0x82   :  { %2862 = vmatmul.mubr.bf16.gmra.mxu0 %v3670_v63 }
  0x83   :  { %2929 = vmatprep.mubr.bf16.mxu0 %v3625_v6 }
  0x8a   :  { %2930 = vmatmul.mubr.bf16.vlgmr.msra.gmra.mxu0 %v3628_v16 }
  0x8b   :  { %2933 = vmatprep.mubr.bf16.mxu0 %v3630_v18 }
  0x92   :  { %2934 = vmatmul.mubr.bf16.gmra.mxu0 %v3634_v24 }
  0x93   :  { %2937 = vmatprep.mubr.bf16.mxu0 %v3636_v25 }
  0x9a   :  { %2938 = vmatmul.mubr.bf16.gmra.mxu0 %v3640_v32 }
  0x9b   :  { %2941 = vmatprep.mubr.bf16.mxu0 %v3642_v33 }
  0xa2   :  { %2942 = vmatmul.mubr.bf16.gmra.mxu0 %v3646_v40 }
  0xa3   :  { %2945 = vmatprep.mubr.bf16.mxu0 %v3648_v41 }
  0xaa   :  { %2946 = vmatmul.mubr.bf16.gmra.mxu0 %v3652_v47 }
  0xab   :  { %2949 = vmatprep.mubr.bf16.mxu0 %v3654_v48 }
  0xb2   :  { %2950 = vmatmul.mubr.bf16.gmra.mxu0 %v3658_v53 }
  0xb3   :  { %2953 = vmatprep.mubr.bf16.mxu0 %v3660_v54 }
  0xba   :  { %2954 = vmatmul.mubr.bf16.gmra.mxu0 %v3664_v59 }
  0xbb   :  { %2957 = vmatprep.mubr.bf16.mxu0 %v3666_v60 }
  0xc2   :  { %2958 = vmatmul.mubr.bf16.gmra.mxu0 %v3670_v63 }
 0x10a   :  { %v2835_v15 = vpop.f32.mrf.mxu0 }
 0x10b   :  { %v3702_v20 = vadd.f32 %v2835_v15, %v3697_v11  ;;  %v120_v15 = vadd.s32 56, %v3690_v2 }
 0x10c   :  { %v360_v26 = vpop.f32.mrf.mxu0 }
 0x10d   :  { %v3707_v29 = vadd.f32 %v3697_v11, %v360_v26  ;;  %491 = vmax.xlane.f32.xlu1 %v3702_v20  ;;  %v136_v26 = vcvt.s32.f32 %v120_v15  ;;  %v4878_v15 = vmov 0 }
 0x10e   :  { %v2836_v34 = vpop.f32.mrf.mxu0 }
 0x10f   :  { %v3713_v39 = vadd.f32 %v2836_v34, %v3697_v11  ;;  %487 = vmax.xlane.f32.xlu0 %v3707_v29  ;;  %v173_v34 = vmul.f32 0.03125, %v157_v19  ;;  %v155_v37 = vadd.f32 0.5, %v136_v26  ;;  %v131_v19 = vcvt.s32.f32 %v115_v8 }
 0x110   :  { %v363_v42 = vpop.f32.mrf.mxu0  ;;  %v169_v26 = vmul.f32 0.03125, %v153_v13 }
 0x111   :  { %v3723_v50 = vadd.f32 %v3697_v11, %v363_v42  ;;  %493 = vmax.xlane.f32.xlu1 %v3713_v39  ;;  %v189_v42 = vfloor.f32 %v173_v34  ;;  %v150_v34 = vadd.f32 0.5, %v131_v19  ;;  %v164_v19 = vmul.f32 0.03125, %v148_v4 }
 0x112   :  { %v2839_v52 = vpop.f32.mrf.mxu0  ;;  %v185_v38 = vfloor.f32 %v169_v26 }
 0x113   :  { %489 = vmax.xlane.f32.xlu0 %v3723_v50  ;;  %v3756_v27 = vadd.f32 %v2839_v52, %v3697_v11  ;;  %v171_v52 = vmul.f32 0.03125, %v155_v37  ;;  %vm208_vm10 = vcmp.eq.f32.partialorder %v189_v42, %v3704_v23  ;;  %v114_v42 = vadd.s32 8, %v3690_v2 }
 0x114   :  { %v376_v0 = vpop.f32.mrf.mxu0  ;;  %vm3783_vm11 = vmpackc.low %vm208_vm10, %vm207_vm9  ;;  %vm204_vm0 = vcmp.eq.f32.partialorder %v185_v38, %v3704_v23  ;;  %v180_v26 = vfloor.f32 %v164_v19  ;;  %v4887_v38 = vmov 0 }
 0x115   :  { %v3738_v5 = vadd.f32 %v3697_v11, %v376_v0  ;;  %v4876_v61 = vsel %vm3783_vm11, 4294967295, %v4875_v61  ;;  %v187_v0 = vfloor.f32 %v171_v52  ;;  %2871 = vmatprep.subr.msk.bf16.mxu1 %vm3783_vm11, %v3579_v51  ;;  %v130_v57 = vcvt.s32.f32 %v114_v42  ;;  %vm3829_vm1 = vmpackc.low %vm204_vm0, %vm203_vm15 }
 0x116   :  { %v2840_v10 = vpop.f32.mrf.mxu0  ;;  %4877 = vst [vmem:[#allocation32_spill] sm:$0xff] %v4876_v61  ;;  %2872 = vmatpush3.bf16.msk.msra.mxu1 %vm3783_vm11, %v3579_v51  ;;  %vm199_vm7 = vcmp.eq.f32.partialorder %v180_v26, %v3704_v23 }
 0x117   :  { %495 = vmax.xlane.f32.xlu0 %v3738_v5  ;;  %v3772_v45 = vadd.f32 %v2840_v10, %v3697_v11  ;;  %vm206_vm13 = vcmp.eq.f32.partialorder %v187_v0, %v3704_v23  ;;  %v149_v8 = vadd.f32 0.5, %v130_v57 }
 0x118   :  { %v379_v21 = vpop.f32.mrf.mxu0  ;;  %vm3805_vm14 = vmpackc.low %vm206_vm13, %vm205_vm12  ;;  %vm3580_vm12 = vmmov 0  }
 0x119   :  { %v3759_v28 = vadd.f32 %v3697_v11, %v379_v21  ;;  %v4879_v15 = vsel %vm3805_vm14, 4294967295, %v4878_v15  ;;  %v132_v21 = vcvt.s32.f32 %v116_v9  ;;  %2873 = vmatprep.subr.msk.bf16.mxu1 %vm3805_vm14, %v3579_v51  ;;  %3025 = vmatprep.mubr.msk.bf16.mxu0 %vm3580_vm12, %v4770_v1 }
 0x11a   :  { %v2843_v35 = vpop.f32.mrf.mxu0  ;;  %4880 = vst [vmem:[#allocation33_spill] sm:$0xff] %v4879_v15  ;;  %2874 = vmatpush3.bf16.msk.msra.mxu1 %vm3805_vm14, %v3579_v51 }
 0x11b   :  { %497 = vmax.xlane.f32.xlu1 %v3759_v28  ;;  %499 = vmax.xlane.f32.xlu0 %v3756_v27  ;;  %v3792_v10 = vadd.f32 %v2843_v35, %v3697_v11  ;;  %v151_v35 = vadd.f32 0.5, %v132_v21  ;;  %v165_v21 = vmul.f32 0.03125, %v149_v8 }
 0x11c   :  { %v392_v46 = vpop.f32.mrf.mxu0  ;;  %2875 = vmatprep.subr.msk.bf16.mxu1 %vm3829_vm1, %v3579_v51 }
 0x11d   :  { %v3779_v56 = vadd.f32 %v3697_v11, %v392_v46  ;;  %v166_v46 = vmul.f32 0.03125, %v150_v34  ;;  %v167_v49 = vmul.f32 0.03125, %v151_v35  ;;  %v181_v31 = vfloor.f32 %v165_v21 }
 0x11e   :  { %v2844_v58 = vpop.f32.mrf.mxu0  ;;  %2876 = vmatpush3.bf16.msk.msra.mxu1 %vm3829_vm1, %v3579_v51 }
 0x11f   :  { %501 = vmax.xlane.f32.xlu1 %v3772_v45  ;;  %503 = vmax.xlane.f32.xlu0 %v3779_v56  ;;  %v3815_v36 = vadd.f32 %v2844_v58, %v3697_v11  ;;  %v4881_v58 = vmov 0  ;;  %v182_v62 = vfloor.f32 %v166_v46  ;;  %v183_v0 = vfloor.f32 %v167_v49 }
 0x120   :  { %v395_v12 = vpop.f32.mrf.mxu0  ;;  %v4882_v58 = vsel %vm3829_vm1, 4294967295, %v4881_v58  ;;  %vm200_vm9 = vcmp.eq.f32.partialorder %v181_v31, %v3704_v23 }
 0x121   :  { %v3800_v14 = vadd.f32 %v3697_v11, %v395_v12  ;;  %4883 = vst [vmem:[#allocation34_spill] sm:$0xff] %v4882_v58  ;;  %vm201_vm3 = vcmp.eq.f32.partialorder %v182_v62, %v3704_v23  ;;  %vm202_vm4 = vcmp.eq.f32.partialorder %v183_v0, %v3704_v23  ;;  %vm3869_vm10 = vmpackc.low %vm200_vm9, %vm199_vm7 }
 0x122   :  { %v2847_v22 = vpop.f32.mrf.mxu0  ;;  %vm3847_vm6 = vmpackc.low %vm202_vm4, %vm201_vm3  ;;  %v4888_v38 = vsel %vm3869_vm10, 4294967295, %v4887_v38 }
 0x123   :  { %505 = vmax.xlane.f32.xlu1 %v3800_v14  ;;  %507 = vmax.xlane.f32.xlu0 %v3792_v10  ;;  %v3837_v9 = vadd.f32 %v2847_v22, %v3697_v11  ;;  %v4885_v17 = vsel %vm3847_vm6, 4294967295, %v4884_v17  ;;  %4889 = vst [vmem:[#allocation36_spill] sm:$0xff] %v4888_v38 }
 0x124   :  { %v408_v37 = vpop.f32.mrf.mxu0  ;;  %4886 = vst [vmem:[#allocation35_spill] sm:$0xff] %v4885_v17  ;;  %2877 = vmatprep.subr.msk.bf16.mxu1 %vm3847_vm6, %v3579_v51 }
 0x125   :  { %v3819_v44 = vadd.f32 %v3697_v11, %v408_v37  ;;  %2878 = vmatpush3.bf16.msk.msra.mxu1 %vm3847_vm6, %v3579_v51 }
 0x126   :  { %v2848_v52 = vpop.f32.mrf.mxu0  ;;  %2879 = vmatprep.subr.msk.bf16.mxu1 %vm3869_vm10, %v3579_v51 }
 0x127   :  { %509 = vmax.xlane.f32.xlu1 %v3815_v36  ;;  %511 = vmax.xlane.f32.xlu0 %v3819_v44  ;;  %v3857_v34 = vadd.f32 %v2848_v52, %v3697_v11 }
 0x128   :  { %v411_v3 = vpop.f32.mrf.mxu0 }
 0x129   :  { %v3840_v12 = vadd.f32 %v3697_v11, %v411_v3  ;;  %2880 = vmatpush3.bf16.msk.msra.mxu1 %vm3869_vm10, %v3579_v51 }
 0x12a   :  { %v2851_v13 = vpop.f32.mrf.mxu0 }
 0x12b   :  { %513 = vmax.xlane.f32.xlu1 %v3840_v12  ;;  %515 = vmax.xlane.f32.xlu0 %v3837_v9  ;;  %v3877_v46 = vadd.f32 %v2851_v13, %v3697_v11 }
 0x12c   :  { %v424_v22 = vpop.f32.mrf.mxu0 }
 0x12d   :  { %v3860_v35 = vadd.f32 %v3697_v11, %v424_v22 }
 0x12e   :  { %v2852_v37 = vpop.f32.mrf.mxu0 }
 0x12f   :  { %517 = vmax.xlane.f32.xlu1 %v3857_v34  ;;  %519 = vmax.xlane.f32.xlu0 %v3860_v35  ;;  %v3890_v55 = vadd.f32 %v2852_v37, %v3697_v11 }
 0x130   :  { %v427_v42 = vpop.f32.mrf.mxu0 }
 0x131   :  { %v3880_v49 = vadd.f32 %v3697_v11, %v427_v42 }
 0x132   :  { %v2855_v23 = vpop.f32.mrf.mxu0 }
 0x133   :  { %521 = vmax.xlane.f32.xlu1 %v3880_v49  ;;  %523 = vmax.xlane.f32.xlu0 %v3877_v46  ;;  %v3898_v0 = vadd.f32 %v2855_v23, %v3697_v11 }
 0x134   :  { %v440_v52 = vpop.f32.mrf.mxu0 }
 0x135   :  { %v3893_v57 = vadd.f32 %v3697_v11, %v440_v52  ;;  %4890 = vst [vmem:[#allocation37_spill] sm:$0xff] %v3898_v0 }
 0x136   :  { %v2856_v62 = vpop.f32.mrf.mxu0 }
 0x137   :  { %525 = vmax.xlane.f32.xlu1 %v3890_v55  ;;  %527 = vmax.xlane.f32.xlu0 %v3893_v57  ;;  %v3906_v13 = vadd.f32 %v2856_v62, %v3697_v11 }
 0x138   :  { %v443_v51 = vpop.f32.mrf.mxu0 }
 0x139   :  { %v3901_v3 = vadd.f32 %v3697_v11, %v443_v51  ;;  %4891 = vst [vmem:[#allocation38_spill] sm:$0xff] %v3906_v13 }
 0x13a   :  { %v2859_v4 = vpop.f32.mrf.mxu0 }
 0x13b   :  { %529 = vmax.xlane.f32.xlu1 %v3901_v3  ;;  %531 = vmax.xlane.f32.xlu0 %v3898_v0  ;;  %v3914_v26 = vadd.f32 %v2859_v4, %v3697_v11 }
 0x13c   :  { %v456_v8 = vpop.f32.mrf.mxu0 }
 0x13d   :  { %v3909_v19 = vadd.f32 %v3697_v11, %v456_v8  ;;  %4893 = vst [vmem:[#allocation40_spill] sm:$0xff] %v3914_v26 }
 0x13e   :  { %v2860_v21 = vpop.f32.mrf.mxu0 }
 0x13f   :  { %4892 = vst [vmem:[#allocation39_spill] sm:$0xff] %v3909_v19  ;;  %533 = vmax.xlane.f32.xlu1 %v3906_v13  ;;  %535 = vmax.xlane.f32.xlu0 %v3909_v19  ;;  %v3922_v23 = vadd.f32 %v2860_v21, %v3697_v11 }
 0x140   :  { %v459_v22 = vpop.f32.mrf.mxu0 }
 0x141   :  { %v3917_v31 = vadd.f32 %v3697_v11, %v459_v22  ;;  %4895 = vst [vmem:[#allocation42_spill] sm:$0xff] %v3922_v23 }
 0x142   :  { %v2863_v37 = vpop.f32.mrf.mxu0 }
 0x143   :  { %4894 = vst [vmem:[#allocation41_spill] sm:$0xff] %v3917_v31  ;;  %537 = vmax.xlane.f32.xlu1 %v3917_v31  ;;  %539 = vmax.xlane.f32.xlu0 %v3914_v26  ;;  %v3930_v4 = vadd.f32 %v2863_v37, %v3697_v11  ;;  %v3941_v37 = vld [vmem:[#allocation5 + $0xb0] ss:$12 sps:$4 sm:$0xff]  }
 0x144   :  { %v472_v42 = vpop.f32.mrf.mxu0  ;;  %2961 = vmatprep.subr.bf16.mxu1 %v3941_v37 }
 0x145   :  { %v3925_v52 = vadd.f32 %v3697_v11, %v472_v42  ;;  %4897 = vst [vmem:[#allocation44_spill] sm:$0xff] %v3930_v4 }
 0x146   :  { %v2864_v62 = vpop.f32.mrf.mxu0 }
 0x147   :  { %4896 = vst [vmem:[#allocation43_spill] sm:$0xff] %v3925_v52  ;;  %541 = vmax.xlane.f32.xlu1 %v3922_v23  ;;  %543 = vmax.xlane.f32.xlu0 %v3925_v52  ;;  %v3938_v42 = vadd.f32 %v2864_v62, %v3697_v11 }
 0x148   :  { %v475_v51 = vpop.f32.mrf.mxu0 }
 0x149   :  { %v3933_v8 = vadd.f32 %v3697_v11, %v475_v51  ;;  %4899 = vst [vmem:[#allocation46_spill] sm:$0xff] %v3938_v42  ;;  %v3947_v51 = vld [vmem:[%s4766_s2 + $0x1] ss:$0 sm:$0xff] }
 0x14a   :  { %v2931_v22 = vpop.f32.mrf.mxu0 }
 0x14b   :  { %4898 = vst [vmem:[#allocation45_spill] sm:$0xff] %v3933_v8  ;;  %545 = vmax.xlane.f32.xlu1 %v3933_v8  ;;  %547 = vmax.xlane.f32.xlu0 %v3930_v4  ;;  %v3950_v11 = vadd.f32 %v2931_v22, %v3947_v51 }
 0x14c   :  { %v1025_v21 = vpop.f32.mrf.mxu0 }
 0x14d   :  { %v3956_v38 = vadd.f32 %v3947_v51, %v1025_v21 }
 0x14e   :  { %v2932_v1 = vpop.f32.mrf.mxu0 }
 0x14f   :  { %549 = vmax.xlane.f32.xlu1 %v3938_v42  ;;  %v3959_v2 = vadd.f32 %v2932_v1, %v3947_v51 }
 0x150   :  { %v1028_v43 = vpop.f32.mrf.mxu0 }
 0x151   :  { %v3968_v22 = vadd.f32 %v3947_v51, %v1028_v43 }
 0x152   :  { %v2935_v7 = vpop.f32.mrf.mxu0 }
 0x153   :  { %v3953_v62 = vadd.f32 %v2935_v7, %v3947_v51 }
 0x154   :  { %v1041_v30 = vpop.f32.mrf.mxu0 }
 0x155   :  { %v3962_v63 = vadd.f32 %v3947_v51, %v1041_v30  ;;  %v1419_v7 = vmax.f32 %v3950_v11, %v3953_v62 }
 0x156   :  { %v2936_v61 = vpop.f32.mrf.mxu0 }
 0x157   :  { %v3965_v60 = vadd.f32 %v2936_v61, %v3947_v51  ;;  %v1417_v30 = vmax.f32 %v3956_v38, %v3962_v63 }
 0x158   :  { %v1044_v15 = vpop.f32.mrf.mxu0 }
 0x159   :  { %v3973_v54 = vadd.f32 %v3947_v51, %v1044_v15  ;;  %v1420_v61 = vmax.f32 %v3959_v2, %v3965_v60 }
 0x15a   :  { %v2939_v58 = vpop.f32.mrf.mxu0 }
 0x15b   :  { %v1066_v21 = vadd.f32 %v2939_v58, %v3947_v51  ;;  %v1418_v47 = vmax.f32 %v3968_v22, %v3973_v54 }
 0x15c   :  { %v1057_v17 = vpop.f32.mrf.mxu0 }
 0x15d   :  { %v1058_v53 = vadd.f32 %v3947_v51, %v1057_v17  ;;  %v1423_v41 = vmax.f32 %v1419_v7, %v1066_v21 }
 0x15e   :  { %v2940_v59 = vpop.f32.mrf.mxu0 }
 0x15f   :  { %v1069_v43 = vadd.f32 %v2940_v59, %v3947_v51  ;;  %v1421_v33 = vmax.f32 %v1417_v30, %v1058_v53 }
 0x160   :  { %v1060_v1 = vpop.f32.mrf.mxu0 }
 0x161   :  { %v1061_v15 = vadd.f32 %v3947_v51, %v1060_v1  ;;  %v1424_v32 = vmax.f32 %v1420_v61, %v1069_v43 }
 0x162   :  { %v2943_v48 = vpop.f32.mrf.mxu0 }
 0x163   :  { %v1082_v58 = vadd.f32 %v2943_v48, %v3947_v51  ;;  %v1422_v18 = vmax.f32 %v1418_v47, %v1061_v15 }
 0x164   :  { %v1073_v40 = vpop.f32.mrf.mxu0 }
 0x165   :  { %v1074_v25 = vadd.f32 %v3947_v51, %v1073_v40  ;;  %v1427_v16 = vmax.f32 %v1423_v41, %v1082_v58 }
 0x166   :  { %v2944_v24 = vpop.f32.mrf.mxu0 }
 0x167   :  { %v1085_v17 = vadd.f32 %v2944_v24, %v3947_v51  ;;  %v1425_v6 = vmax.f32 %v1421_v33, %v1074_v25 }
 0x168   :  { %v1076_v59 = vpop.f32.mrf.mxu0 }
 0x169   :  { %v1428_v42 = vmax.f32 %v1424_v32, %v1085_v17  ;;  %v1077_v4 = vadd.f32 %v3947_v51, %v1076_v59 }
 0x16b   :  { %v1430_v7 = vmax.f32 %v1427_v16, %v1428_v42  ;;  %v1426_v8 = vmax.f32 %v1422_v18, %v1077_v4 }
 0x16d   :  { %v1429_v1 = vmax.f32 %v1425_v6, %v1426_v8 }
 0x16f   :  { %v1431_v52 = vmax.f32 %v1429_v1, %v1430_v7 }
 0x171   :  { %v1432_v48 = vrot.slane %v1431_v52, 4 }
 0x173   :  { %v1433_v23 = vmax.f32 %v1431_v52, %v1432_v48 }
 0x175   :  { %v1434_v30 = vrot.slane %v1433_v23, 2 }
 0x177   :  { %v1435_v61 = vmax.f32 %v1433_v23, %v1434_v30 }
 0x179   :  { %v1436_v26 = vrot.slane %v1435_v61, 1 }
 0x17b   :  { %v1437_v40 = vmax.f32 %v1435_v61, %v1436_v26 }
 0x17d   :  { %v1451_v31 = vsub.f32 %v1077_v4, %v1437_v40  ;;  %v1452_v47 = vsub.f32 %v1082_v58, %v1437_v40  ;;  %v1453_v41 = vsub.f32 %v1085_v17, %v1437_v40  ;;  %v1450_v19 = vsub.f32 %v1074_v25, %v1437_v40 }
 0x17e   :  { %v1448_v24 = vsub.f32 %v1066_v21, %v1437_v40  ;;  %v1449_v0 = vsub.f32 %v1069_v43, %v1437_v40  ;;  %v1446_v16 = vsub.f32 %v1058_v53, %v1437_v40  ;;  %v1447_v52 = vsub.f32 %v1061_v15, %v1437_v40  ;;  %v2947_v15 = vpop.f32.mrf.mxu0 }
 0x17f   :  { %v1480_v13 = vmul.f32 1.442695, %v1451_v31  ;;  %v1482_v33 = vmul.f32 1.442695, %v1452_v47  ;;  %v1484_v32 = vmul.f32 1.442695, %v1453_v41  ;;  %v1444_v26 = vsub.f32 %v3953_v62, %v1437_v40 }
 0x180   :  { %v1478_v59 = vmul.f32 1.442695, %v1450_v19  ;;  %v1474_v6 = vmul.f32 1.442695, %v1448_v24  ;;  %v1476_v18 = vmul.f32 1.442695, %v1449_v0  ;;  %v1445_v23 = vsub.f32 %v3965_v60, %v1437_v40 }
 0x181   :  { %3287 = vpow2.f32 %v1480_v13  ;;  %v1470_v25 = vmul.f32 1.442695, %v1446_v16  ;;  %v1442_v31 = vsub.f32 %v3962_v63, %v1437_v40  ;;  %v1472_v4 = vmul.f32 1.442695, %v1447_v52 }
 0x182   :  { %3289 = vpow2.f32 %v1482_v33  ;;  %v1438_v19 = vsub.f32 %v3956_v38, %v1437_v40  ;;  %v1466_v13 = vmul.f32 1.442695, %v1444_v26  ;;  %v1439_v8 = vsub.f32 %v3968_v22, %v1437_v40 }
 0x183   :  { %3291 = vpow2.f32 %v1484_v32  ;;  %v1468_v53 = vmul.f32 1.442695, %v1445_v23  ;;  %v1440_v0 = vsub.f32 %v3950_v11, %v1437_v40  ;;  %v1462_v42 = vmul.f32 1.442695, %v1442_v31  ;;  %v1089_v11 = vpop.f32.mrf.mxu0 }
 0x184   :  { %3293 = vpow2.f32 %v1478_v59  ;;  %v1441_v62 = vsub.f32 %v3959_v2, %v1437_v40  ;;  %v1443_v60 = vsub.f32 %v3973_v54, %v1437_v40  ;;  %v1454_v21 = vmul.f32 1.442695, %v1438_v19 }
 0x185   :  { %3295 = vpow2.f32 %v1474_v6  ;;  %v1456_v63 = vmul.f32 1.442695, %v1439_v8  ;;  %v1458_v43 = vmul.f32 1.442695, %v1440_v0  ;;  %v2948_v54 = vpop.f32.mrf.mxu0  ;;  %v4900_v47 = vmov 0.0  }
 0x186   :  { %3297 = vpow2.f32 %v1476_v18  ;;  %v1460_v58 = vmul.f32 1.442695, %v1441_v62  ;;  %v1464_v17 = vmul.f32 1.442695, %v1443_v60  ;;  %v4004_v41 = vadd.f32 %v2947_v15, %v3947_v51 }
 0x187   :  { %3299 = vpow2.f32 %v1470_v25  ;;  %v1092_v61 = vpop.f32.mrf.mxu0  ;;  %v4007_v32 = vadd.f32 %v3947_v51, %v1089_v11  ;;  %v4017_v23 = vadd.f32 %v2948_v54, %v3947_v51 }
 0x188   :  { %3301 = vpow2.f32 %v1472_v4 }
 0x189   :  { %3303 = vpow2.f32 %v1466_v13  ;;  %v2951_v24 = vpop.f32.mrf.mxu0 }
 0x18a   :  { %3305 = vpow2.f32 %v1468_v53  ;;  %v4010_v59 = vadd.f32 %v2951_v24, %v3947_v51 }
 0x18b   :  { %3307 = vpow2.f32 %v1462_v42  ;;  %v1105_v18 = vpop.f32.mrf.mxu0  ;;  %v4027_v42 = vadd.f32 %v3947_v51, %v1092_v61 }
 0x18c   :  { %3309 = vpow2.f32 %v1454_v21  ;;  %v1974_v25 = vmax.f32 %v4004_v41, %v4010_v59  ;;  %v4022_v31 = vadd.f32 %v3947_v51, %v1105_v18 }
 0x18d   :  { %3311 = vpow2.f32 %v1456_v63  ;;  %v2952_v13 = vpop.f32.mrf.mxu0 }
 0x18e   :  { %v3288_v38 = vpop.eup %3287  ;;  %3313 = vpow2.f32 %v1458_v43  ;;  %v1972_v62 = vmax.f32 %v4007_v32, %v4022_v31  ;;  %v4032_v60 = vadd.f32 %v2952_v13, %v3947_v51 }
 0x18f   :  { %v3290_v22 = vpop.eup %3289  ;;  %3315 = vpow2.f32 %v1460_v58  ;;  %v1108_v15 = vpop.f32.mrf.mxu0 }
 0x190   :  { %v3292_v7 = vpop.eup %3291  ;;  %3317 = vpow2.f32 %v1464_v17  ;;  %v1975_v58 = vmax.f32 %v4017_v23, %v4032_v60 }
 0x191   :  { %v3294_v1 = vpop.eup %3293  ;;  %v3997_v2 = vpack.c.bf16 %v3292_v7, %v3290_v22  ;;  %v4042_v22 = vadd.f32 %v3947_v51, %v1108_v15 }
 0x192   :  { %v3296_v48 = vpop.eup %3295  ;;  %v4000_v30 = vpack.c.bf16 %v3288_v38, %v3294_v1 }
 0x193   :  { %3010 = vmatpush3.bf16.msra.mxu0 %v3997_v2  ;;  %v3298_v40 = vpop.eup %3297  ;;  %v1973_v61 = vmax.f32 %v4027_v42, %v4042_v22 }
 0x194   :  { %3011 = vmatprep.subr.bf16.mxu0 %v4900_v47  ;;  %v3300_v6 = vpop.eup %3299  ;;  %v4013_v16 = vpack.c.bf16 %v3298_v40, %v3296_v48 }
 0x195   :  { %v3302_v52 = vpop.eup %3301 }
 0x196   :  { %v492_v33 = vpop.xlane.xlu1 %491  ;;  %v3304_v4 = vpop.eup %3303 }
 0x197   :  { %3012 = vmatpush3.bf16.msra.mxu0 %v4000_v30  ;;  %v3306_v8 = vpop.eup %3305  ;;  %v553_v53 = vsub.f32 %v3702_v20, %v492_v33 }
 0x198   :  { %v488_v26 = vpop.xlane.xlu0 %487  ;;  %3013 = vmatprep.subr.bf16.mxu0 %v4900_v47  ;;  %v3308_v21 = vpop.eup %3307 }
 0x199   :  { %v551_v19 = vsub.f32 %v3707_v29, %v488_v26  ;;  %v4036_v29 = vpack.c.bf16 %v3302_v52, %v3300_v6  ;;  %v3310_v20 = vpop.eup %3309  ;;  %v587_v54 = vmul.f32 1.442695, %v553_v53  ;;  %v1489_v6 = vpack.c.bf16 %v3306_v8, %v3304_v4 }
 0x19a   :  { %v494_v0 = vpop.xlane.xlu1 %493  ;;  %v3312_v17 = vpop.eup %3311 }
 0x19b   :  { %v583_v63 = vmul.f32 1.442695, %v551_v19  ;;  %v554_v43 = vsub.f32 %v3713_v39, %v494_v0  ;;  %3014 = vmatpush3.bf16.msra.mxu0 %v4013_v16  ;;  %v2955_v39 = vpop.f32.mrf.mxu0  ;;  %v3314_v1 = vpop.eup %3313  ;;  %v4045_v48 = vpack.c.bf16 %v3312_v17, %v3310_v20 }
 0x19c   :  { %v490_v38 = vpop.xlane.xlu0 %489  ;;  %3015 = vmatprep.subr.bf16.mxu0 %v4900_v47  ;;  %v4050_v40 = vadd.f32 %v2955_v39, %v3947_v51  ;;  %v3316_v24 = vpop.eup %3315 }
 0x19d   :  { %v589_v11 = vmul.f32 1.442695, %v554_v43  ;;  %v552_v7 = vsub.f32 %v3723_v50, %v490_v38  ;;  %3319 = vpow2.f32 %v583_v63  ;;  %v1121_v18 = vpop.f32.mrf.mxu0  ;;  %v3318_v52 = vpop.eup %3317  ;;  %1534 = vxpose.xlu0.c.b16.start [1/8] %v4045_v48, 128  ;;  %v1487_v0 = vpack.c.bf16 %v3316_v24, %v3314_v1 }
 0x19e   :  { %v1978_v26 = vmax.f32 %v1974_v25, %v4050_v40  ;;  %v4056_v19 = vadd.f32 %v3947_v51, %v1121_v18  ;;  %v1488_v63 = vpack.c.bf16 %v3318_v52, %v3308_v21 }
 0x19f   :  { %v585_v33 = vmul.f32 1.442695, %v552_v7  ;;  %3016 = vmatpush3.bf16.msra.mxu0 %v4036_v29  ;;  %3321 = vpow2.f32 %v589_v11  ;;  %v2956_v53 = vpop.f32.mrf.mxu0 }
 0x1a0   :  { %v496_v50 = vpop.xlane.xlu0 %495  ;;  %3017 = vmatprep.subr.bf16.mxu0 %v4900_v47  ;;  %v4061_v4 = vmax.f32 %v1972_v62, %v4056_v19  ;;  %v4064_v8 = vadd.f32 %v2956_v53, %v3947_v51 }
 0x1a1   :  { %3323 = vpow2.f32 %v585_v33  ;;  %v555_v13 = vsub.f32 %v3738_v5, %v496_v50  ;;  %v1124_v25 = vpop.f32.mrf.mxu0  ;;  %1535 = vxpose.xlu0.c.b16.cont [2/8] %v1487_v0, 128 }
 0x1a2   :  { %3325 = vpow2.f32 %v587_v54  ;;  %v1979_v38 = vmax.f32 %v1975_v58, %v4064_v8  ;;  %v4069_v5 = vadd.f32 %v3947_v51, %v1124_v25 }
 0x1a3   :  { %3018 = vmatpush3.bf16.msra.mxu0 %v1489_v6  ;;  %v591_v43 = vmul.f32 1.442695, %v555_v13  ;;  %v2959_v11 = vpop.f32.mrf.mxu0 }
 0x1a4   :  { %v498_v15 = vpop.xlane.xlu1 %497  ;;  %v500_v20 = vpop.xlane.xlu0 %499  ;;  %3019 = vmatprep.subr.bf16.mxu0 %v4900_v47  ;;  %v4074_v7 = vmax.f32 %v1973_v61, %v4069_v5  ;;  %v4077_v21 = vadd.f32 %v2959_v11, %v3947_v51 }
 0x1a5   :  { %v556_v62 = vsub.f32 %v3759_v28, %v498_v15  ;;  %v557_v17 = vsub.f32 %v3756_v27, %v500_v20  ;;  %v1137_v1 = vpop.f32.mrf.mxu0  ;;  %3327 = vpow2.f32 %v591_v43  ;;  %1536 = vxpose.xlu0.c.b16.cont [3/8] %v1488_v63, 128 }
 0x1a6   :  { %v1982_v28 = vmax.f32 %v1978_v26, %v4077_v21  ;;  %v4082_v27 = vadd.f32 %v3947_v51, %v1137_v1 }
 0x1a7   :  { %v593_v39 = vmul.f32 1.442695, %v556_v62  ;;  %3020 = vmatpush3.bf16.msra.mxu0 %v1488_v63  ;;  %v595_v58 = vmul.f32 1.442695, %v557_v17  ;;  %v2960_v18 = vpop.f32.mrf.mxu0 }
 0x1a8   :  { %v502_v54 = vpop.xlane.xlu1 %501  ;;  %v504_v24 = vpop.xlane.xlu0 %503  ;;  %3021 = vmatprep.subr.bf16.mxu0 %v4900_v47  ;;  %v1980_v52 = vmax.f32 %v4061_v4, %v4082_v27  ;;  %v4089_v50 = vadd.f32 %v2960_v18, %v3947_v51  ;;  %v4942_v4 = vld [vmem:[#allocation27_spill] sm:$0xff] }
 0x1a9   :  { %3329 = vpow2.f32 %v593_v39  ;;  %v558_v61 = vsub.f32 %v3772_v45, %v502_v54  ;;  %v559_v33 = vsub.f32 %v3779_v56, %v504_v24  ;;  %1537 = vxpose.xlu0.c.b16.cont [4/8] %v1489_v6, 128  ;;  %v4816_v54 = vmov 1065369472  }
 0x1aa   :  { %v4091_v53 = vpop.eup %3319  ;;  %3331 = vpow2.f32 %v595_v58  ;;  %v1983_v45 = vmax.f32 %v1979_v38, %v4089_v50 }
 0x1ab   :  { %v597_v13 = vmul.f32 1.442695, %v558_v61  ;;  %3022 = vmatpush3.bf16.msra.mxu0 %v1487_v0  ;;  %v599_v26 = vmul.f32 1.442695, %v559_v33  ;;  %v3273_v33 = vld [vmem:[#allocation5 + $0x80] ss:$12 sps:$4 sm:$0xff]  }
 0x1ac   :  { %v506_v25 = vpop.xlane.xlu1 %505  ;;  %v508_v63 = vpop.xlane.xlu0 %507  ;;  %3023 = vmatprep.subr.bf16.mxu0 %v4900_v47  ;;  %v4101_v0 = vmax.f32 %v1982_v28, %v1983_v45 }
 0x1ad   :  { %v4095_v56 = vpop.eup %3321  ;;  %3333 = vpow2.f32 %v597_v13  ;;  %v560_v43 = vsub.f32 %v3800_v14, %v506_v25  ;;  %v561_v15 = vsub.f32 %v3792_v10, %v508_v63  ;;  %v3272_v10 = vld [vmem:[#allocation5 + $0x98] ss:$12 sps:$4 sm:$0xff]   ;;  %1538 = vxpose.xlu0.c.b16.cont [5/8] %v4036_v29, 128 }
 0x1ae   :  { %v4099_v20 = vpop.eup %3323  ;;  %3335 = vpow2.f32 %v599_v26 }
 0x1af   :  { %v4103_v62 = vpop.eup %3325  ;;  %v601_v17 = vmul.f32 1.442695, %v560_v43  ;;  %v647_v11 = vpack.c.bf16 %v4099_v20, %v4091_v53  ;;  %3024 = vmatpush3.bf16.msra.mxu0 %v4045_v48  ;;  %v603_v6 = vmul.f32 1.442695, %v561_v15 }
 0x1b0   :  { %v510_v38 = vpop.xlane.xlu1 %509  ;;  %v512_v39 = vpop.xlane.xlu0 %511  ;;  %v648_v14 = vpack.c.bf16 %v4095_v56, %v4103_v62 }
 0x1b1   :  { %3337 = vpow2.f32 %v601_v17  ;;  %v562_v1 = vsub.f32 %v3815_v36, %v510_v38  ;;  %v563_v58 = vsub.f32 %v3819_v44, %v512_v39  ;;  %2881 = vmatprep.mubr.bf16.mxu1 %v647_v11  ;;  %1539 = vxpose.xlu0.c.b16.cont [6/8] %v4013_v16, 128  ;;  %v3274_v16 = vld [vmem:[#allocation5 + $0x68] ss:$12 sps:$4 sm:$0xff]  }
 0x1b2   :  { %2882 = vmatmul.mubr.bf16.vlgmr.msra.gmra.mxu1 %v648_v14  ;;  %3026 = vmatmul.mubr.bf16.vlgmr.msra.gmra.mxu0 %v4816_v54  ;;  %3339 = vpow2.f32 %v603_v6  ;;  %v4116_v29 = vpop.eup %3327 }
 0x1b3   :  { %v605_v48 = vmul.f32 1.442695, %v562_v1  ;;  %2962 = vmatpush3.bf16.msra.mxu1 %v3941_v37  ;;  %v607_v24 = vmul.f32 1.442695, %v563_v58 }
 0x1b4   :  { %v514_v28 = vpop.xlane.xlu1 %513  ;;  %v516_v61 = vpop.xlane.xlu0 %515  ;;  %2963 = vmatprep.subr.bf16.mxu1 %v3272_v10 }
 0x1b5   :  { %3341 = vpow2.f32 %v605_v48  ;;  %v564_v36 = vsub.f32 %v3840_v12, %v514_v28  ;;  %v565_v44 = vsub.f32 %v3837_v9, %v516_v61  ;;  %1540 = vxpose.xlu0.c.b16.cont [7/8] %v4000_v30, 128  ;;  %v3275_v30 = vld [vmem:[#allocation5 + $0x50] ss:$12 sps:$4 sm:$0xff]  }
 0x1b6   :  { %v4120_v18 = vpop.eup %3329  ;;  %3343 = vpow2.f32 %v607_v24 }
 0x1b7   :  { %v609_v13 = vmul.f32 1.442695, %v564_v36  ;;  %v649_v37 = vpack.c.bf16 %v4120_v18, %v4116_v29  ;;  %2964 = vmatpush3.bf16.msra.mxu1 %v3272_v10  ;;  %v611_v26 = vmul.f32 1.442695, %v565_v44  ;;  %v4125_v45 = vpop.eup %3331 }
 0x1b8   :  { %v518_v25 = vpop.xlane.xlu1 %517  ;;  %v520_v63 = vpop.xlane.xlu0 %519  ;;  %2965 = vmatprep.subr.bf16.mxu1 %v3273_v33 }
 0x1b9   :  { %3345 = vpow2.f32 %v609_v13  ;;  %v566_v9 = vsub.f32 %v3857_v34, %v518_v25  ;;  %v567_v12 = vsub.f32 %v3860_v35, %v520_v63  ;;  %2885 = vmatprep.mubr.bf16.mxu1 %v649_v37  ;;  %1541 = vxpose.xlu0.c.b16.end [8/8] %v3997_v2, 128  ;;  %v3276_v2 = vld [vmem:[#allocation5 + $0x38] ss:$12 sps:$4 sm:$0xff]  }
 0x1ba   :  { %v4129_v43 = vpop.eup %3333  ;;  %3347 = vpow2.f32 %v611_v26  ;;  %v3277_v26 = vld [vmem:[#allocation5 + $0x20] ss:$12 sps:$4 sm:$0xff]  }
 0x1bb   :  { %v613_v15 = vmul.f32 1.442695, %v566_v9  ;;  %v650_v17 = vpack.c.bf16 %v4129_v43, %v4125_v45  ;;  %2966 = vmatpush3.bf16.msra.mxu1 %v3273_v33  ;;  %v615_v11 = vmul.f32 1.442695, %v567_v12  ;;  %v4134_v39 = vpop.eup %3335 }
 0x1bc   :  { %v522_v6 = vpop.xlane.xlu1 %521  ;;  %v524_v38 = vpop.xlane.xlu0 %523  ;;  %2967 = vmatprep.subr.bf16.mxu1 %v3274_v16 }
 0x1bd   :  { %3349 = vpow2.f32 %v613_v15  ;;  %v568_v34 = vsub.f32 %v3880_v49, %v522_v6  ;;  %v569_v35 = vsub.f32 %v3877_v46, %v524_v38  ;;  %2886 = vmatmul.mubr.bf16.gmra.mxu1 %v650_v17  ;;  %v3278_v6 = vld [vmem:[#allocation5 + $0x8] ss:$12 sps:$4 sm:$0xff]  }
 0x1be   :  { %v4138_v14 = vpop.eup %3337  ;;  %3351 = vpow2.f32 %v615_v11 }
 0x1bf   :  { %v617_v10 = vmul.f32 1.442695, %v568_v34  ;;  %v651_v1 = vpack.c.bf16 %v4138_v14, %v4134_v39  ;;  %2968 = vmatpush3.bf16.msra.mxu1 %v3274_v16  ;;  %v619_v58 = vmul.f32 1.442695, %v569_v35  ;;  %v4142_v28 = vpop.eup %3339  ;;  %v4903_v34 = vld [vmem:[#allocation39_spill] sm:$0xff] }
 0x1c0   :  { %v526_v48 = vpop.xlane.xlu1 %525  ;;  %v528_v24 = vpop.xlane.xlu0 %527  ;;  %2969 = vmatprep.subr.bf16.mxu1 %v3275_v30 }
 0x1c1   :  { %3353 = vpow2.f32 %v617_v10  ;;  %v570_v49 = vsub.f32 %v3890_v55, %v526_v48  ;;  %v571_v46 = vsub.f32 %v3893_v57, %v528_v24  ;;  %2889 = vmatprep.mubr.bf16.mxu1 %v651_v1  ;;  %v4901_v57 = vld [vmem:[#allocation37_spill] sm:$0xff] }
 0x1c2   :  { %v4146_v61 = vpop.eup %3341  ;;  %3355 = vpow2.f32 %v619_v58 }
 0x1c3   :  { %v621_v33 = vmul.f32 1.442695, %v570_v49  ;;  %v652_v36 = vpack.c.bf16 %v4146_v61, %v4142_v28  ;;  %2970 = vmatpush3.bf16.msra.mxu1 %v3275_v30  ;;  %v623_v44 = vmul.f32 1.442695, %v571_v46  ;;  %v4150_v25 = vpop.eup %3343  ;;  %v4905_v46 = vld [vmem:[#allocation41_spill] sm:$0xff] }
 0x1c4   :  { %v530_v13 = vpop.xlane.xlu1 %529  ;;  %v532_v37 = vpop.xlane.xlu0 %531  ;;  %2971 = vmatprep.subr.bf16.mxu1 %v3276_v2 }
 0x1c5   :  { %3357 = vpow2.f32 %v621_v33  ;;  %v572_v55 = vsub.f32 %v3901_v3, %v530_v13  ;;  %v573_v63 = vsub.f32 %v4901_v57, %v532_v37  ;;  %2890 = vmatmul.mubr.bf16.gmra.mxu1 %v652_v36  ;;  %v4902_v3 = vld [vmem:[#allocation38_spill] sm:$0xff]  ;;  %v4906_v36 = vld [vmem:[#allocation40_spill] sm:$0xff] }
 0x1c6   :  { %v4154_v16 = vpop.eup %3345  ;;  %3359 = vpow2.f32 %v623_v44 }
 0x1c7   :  { %v625_v9 = vmul.f32 1.442695, %v572_v55  ;;  %v653_v12 = vpack.c.bf16 %v4154_v16, %v4150_v25  ;;  %2972 = vmatpush3.bf16.msra.mxu1 %v3276_v2  ;;  %v627_v15 = vmul.f32 1.442695, %v573_v63  ;;  %v4158_v38 = vpop.eup %3347 }
 0x1c8   :  { %v534_v17 = vpop.xlane.xlu1 %533  ;;  %v536_v11 = vpop.xlane.xlu0 %535  ;;  %2973 = vmatprep.subr.bf16.mxu1 %v3277_v26 }
 0x1c9   :  { %3361 = vpow2.f32 %v625_v9  ;;  %v574_v30 = vsub.f32 %v4902_v3, %v534_v17  ;;  %v575_v35 = vsub.f32 %v4903_v34, %v536_v11  ;;  %2893 = vmatprep.mubr.bf16.mxu1 %v653_v12  ;;  %v4909_v12 = vld [vmem:[#allocation42_spill] sm:$0xff]  ;;  %v4910_v17 = vld [vmem:[#allocation43_spill] sm:$0xff] }
 0x1ca   :  { %v4162_v10 = vpop.eup %3349  ;;  %3363 = vpow2.f32 %v627_v15 }
 0x1cb   :  { %v629_v1 = vmul.f32 1.442695, %v574_v30  ;;  %v654_v58 = vpack.c.bf16 %v4162_v10, %v4158_v38  ;;  %2974 = vmatpush3.bf16.msra.mxu1 %v3277_v26  ;;  %v631_v48 = vmul.f32 1.442695, %v575_v35  ;;  %v4166_v49 = vpop.eup %3351 }
 0x1cc   :  { %v538_v24 = vpop.xlane.xlu1 %537  ;;  %v540_v2 = vpop.xlane.xlu0 %539  ;;  %2975 = vmatprep.subr.bf16.mxu1 %v3278_v6  ;;  %4904 = vst [vmem:[#allocation37_spill] sm:$0xff] %v4166_v49 }
 0x1cd   :  { %3365 = vpow2.f32 %v629_v1  ;;  %v576_v33 = vsub.f32 %v4905_v46, %v538_v24  ;;  %v577_v44 = vsub.f32 %v4906_v36, %v540_v2  ;;  %2894 = vmatmul.mubr.bf16.gmra.mxu1 %v654_v58  ;;  %v4914_v2 = vld [vmem:[#allocation44_spill] sm:$0xff] }
 0x1ce   :  { %v4170_v13 = vpop.eup %3353  ;;  %3367 = vpow2.f32 %v631_v48  ;;  %v4913_v48 = vld [vmem:[#allocation45_spill] sm:$0xff] }
 0x1cf   :  { %4907 = vst [vmem:[#allocation38_spill] sm:$0xff] %v4170_v13  ;;  %v633_v37 = vmul.f32 1.442695, %v576_v33  ;;  %v655_v55 = vpack.c.bf16 %v4170_v13, %v4166_v49  ;;  %2976 = vmatpush3.bf16.msra.mxu1 %v3278_v6  ;;  %v635_v26 = vmul.f32 1.442695, %v577_v44  ;;  %v4174_v9 = vpop.eup %3355 }
 0x1d0   :  { %v542_v57 = vpop.xlane.xlu1 %541  ;;  %v544_v63 = vpop.xlane.xlu0 %543  ;;  %4908 = vst [vmem:[#allocation39_spill] sm:$0xff] %v4174_v9 }
 0x1d1   :  { %3369 = vpow2.f32 %v633_v37  ;;  %v578_v15 = vsub.f32 %v4909_v12, %v542_v57  ;;  %v579_v11 = vsub.f32 %v4910_v17, %v544_v63  ;;  %2897 = vmatprep.mubr.bf16.mxu1 %v655_v55  ;;  %v4917_v57 = vld [vmem:[#allocation46_spill] sm:$0xff] }
 0x1d2   :  { %v4178_v3 = vpop.eup %3357  ;;  %3371 = vpow2.f32 %v635_v26 }
 0x1d3   :  { %4911 = vst [vmem:[#allocation41_spill] sm:$0xff] %v4178_v3  ;;  %v637_v30 = vmul.f32 1.442695, %v578_v15  ;;  %v656_v34 = vpack.c.bf16 %v4178_v3, %v4174_v9  ;;  %v639_v6 = vmul.f32 1.442695, %v579_v11  ;;  %v4182_v58 = vpop.eup %3359 }
 0x1d4   :  { %v546_v35 = vpop.xlane.xlu1 %545  ;;  %v548_v1 = vpop.xlane.xlu0 %547  ;;  %4912 = vst [vmem:[#allocation40_spill] sm:$0xff] %v4182_v58 }
 0x1d5   :  { %3373 = vpow2.f32 %v637_v30  ;;  %v580_v24 = vsub.f32 %v4913_v48, %v546_v35  ;;  %v581_v46 = vsub.f32 %v4914_v2, %v548_v1  ;;  %2898 = vmatmul.mubr.bf16.gmra.mxu1 %v656_v34 }
 0x1d6   :  { %v4186_v33 = vpop.eup %3361  ;;  %3375 = vpow2.f32 %v639_v6 }
 0x1d7   :  { %4915 = vst [vmem:[#allocation42_spill] sm:$0xff] %v4186_v33  ;;  %v641_v36 = vmul.f32 1.442695, %v580_v24  ;;  %v657_v44 = vpack.c.bf16 %v4186_v33, %v4182_v58  ;;  %v643_v37 = vmul.f32 1.442695, %v581_v46  ;;  %v4190_v26 = vpop.eup %3363 }
 0x1d8   :  { %v550_v55 = vpop.xlane.xlu1 %549  ;;  %4916 = vst [vmem:[#allocation43_spill] sm:$0xff] %v4190_v26  ;;  %v4398_v33 = vld [vmem:[%s4766_s2 + $0x2] ss:$0 sm:$0xff] }
 0x1d9   :  { %3377 = vpow2.f32 %v641_v36  ;;  %v582_v63 = vsub.f32 %v4917_v57, %v550_v55  ;;  %2901 = vmatprep.mubr.bf16.mxu1 %v657_v44  ;;  %v4928_v55 = vld [vmem:[#allocation13_spill] sm:$0xff]  ;;  %v4929_v57 = vld [vmem:[#allocation14_spill] sm:$0xff] }
 0x1da   :  { %v4193_v12 = vpop.eup %3365  ;;  %3379 = vpow2.f32 %v643_v37  ;;  %v4927_v37 = vld [vmem:[#allocation12_spill] sm:$0xff] }
 0x1db   :  { %4918 = vst [vmem:[#allocation45_spill] sm:$0xff] %v4193_v12  ;;  %v645_v15 = vmul.f32 1.442695, %v582_v63  ;;  %v658_v17 = vpack.c.bf16 %v4193_v12, %v4190_v26  ;;  %v4197_v11 = vpop.eup %3367  ;;  %v4930_v63 = vld [vmem:[#allocation15_spill] sm:$0xff] }
 0x1dc   :  { %4919 = vst [vmem:[#allocation44_spill] sm:$0xff] %v4197_v11 }
 0x1dd   :  { %3381 = vpow2.f32 %v645_v15  ;;  %2902 = vmatmul.mubr.bf16.gmra.mxu1 %v658_v17  ;;  %v4931_v15 = vld [vmem:[#allocation16_spill] sm:$0xff]  ;;  %v1140_v17 = vpop.f32.mrf.mxu0 }
 0x1de   :  { %v4199_v30 = vpop.eup %3369 }
 0x1df   :  { %4920 = vst [vmem:[#allocation46_spill] sm:$0xff] %v4199_v30  ;;  %v659_v34 = vpack.c.bf16 %v4199_v30, %v4197_v11  ;;  %v4203_v6 = vpop.eup %3371 }
 0x1e0   :  { %4921 = vst [vmem:[#allocation47_spill] sm:$0xff] %v4203_v6 }
 0x1e1   :  { %2905 = vmatprep.mubr.bf16.mxu1 %v659_v34  ;;  %v4227_v34 = vadd.f32 %v3947_v51, %v1140_v17  ;;  %v4936_v51 = vld [vmem:[#allocation21_spill] sm:$0xff]  ;;  %v4938_v17 = vld [vmem:[#allocation23_spill] sm:$0xff] }
 0x1e2   :  { %v4205_v35 = vpop.eup %3373 }
 0x1e3   :  { %4922 = vst [vmem:[#allocation48_spill] sm:$0xff] %v4205_v35  ;;  %v660_v1 = vpack.c.bf16 %v4205_v35, %v4203_v6  ;;  %v4209_v48 = vpop.eup %3375 }
 0x1e4   :  { %4923 = vst [vmem:[#allocation49_spill] sm:$0xff] %v4209_v48 }
 0x1e5   :  { %2906 = vmatmul.mubr.bf16.gmra.mxu1 %v660_v1  ;;  %v4932_v1 = vld [vmem:[#allocation17_spill] sm:$0xff] }
 0x1e6   :  { %v4211_v24 = vpop.eup %3377 }
 0x1e7   :  { %4924 = vst [vmem:[#allocation50_spill] sm:$0xff] %v4211_v24  ;;  %v661_v2 = vpack.c.bf16 %v4211_v24, %v4209_v48  ;;  %v4215_v46 = vpop.eup %3379 }
 0x1e8   :  { %4925 = vst [vmem:[#allocation51_spill] sm:$0xff] %v4215_v46 }
 0x1e9   :  { %2909 = vmatprep.mubr.bf16.mxu1 %v661_v2  ;;  %v1981_v2 = vmax.f32 %v4074_v7, %v4227_v34  ;;  %v4939_v7 = vld [vmem:[#allocation24_spill] sm:$0xff] }
 0x1ea   :  { %v4217_v36 = vpop.eup %3381 }
 0x1eb   :  { %4926 = vst [vmem:[#allocation52_spill] sm:$0xff] %v4217_v36  ;;  %v662_v44 = vpack.c.bf16 %v4217_v36, %v4215_v46 }
 0x1ed   :  { %2910 = vmatmul.mubr.bf16.gmra.mxu1 %v662_v44  ;;  %v4933_v44 = vld [vmem:[#allocation18_spill] sm:$0xff] }
 0x1ee   :  { %2977 = vmatprep.mubr.bf16.mxu1 %v4927_v37  ;;  %v1984_v37 = vmax.f32 %v1980_v52, %v1981_v2 }
 0x1f5   :  { %2978 = vmatmul.mubr.bf16.vlgmr.msra.gmra.mxu1 %v4928_v55  ;;  %v4237_v55 = vmax.f32 %v1984_v37, %v4101_v0 }
 0x1f6   :  { %2981 = vmatprep.mubr.bf16.mxu1 %v4929_v57  ;;  %v4934_v57 = vld [vmem:[#allocation19_spill] sm:$0xff] }
 0x1fd   :  { %2982 = vmatmul.mubr.bf16.gmra.mxu1 %v4930_v63  ;;  %v4935_v63 = vld [vmem:[#allocation20_spill] sm:$0xff] }
 0x1fe   :  { %2985 = vmatprep.mubr.bf16.mxu1 %v4931_v15  ;;  %v4937_v15 = vld [vmem:[#allocation22_spill] sm:$0xff] }
 0x1ff   :  { %v1542_v52 = vpop.trf.xlu0 }
 0x205   :  { %2986 = vmatmul.mubr.bf16.gmra.mxu1 %v4932_v1  ;;  %v4940_v1 = vld [vmem:[#allocation25_spill] sm:$0xff] }
 0x206   :  { %2989 = vmatprep.mubr.bf16.mxu1 %v4933_v44  ;;  %v4941_v44 = vld [vmem:[#allocation26_spill] sm:$0xff] }
 0x20d   :  { %2990 = vmatmul.mubr.bf16.gmra.mxu1 %v4934_v57 }
 0x20e   :  { %2993 = vmatprep.mubr.bf16.mxu1 %v4935_v63 }
 0x215   :  { %2994 = vmatmul.mubr.bf16.gmra.mxu1 %v4936_v51 }
 0x216   :  { %2997 = vmatprep.mubr.bf16.mxu1 %v4937_v15 }
 0x21d   :  { %2998 = vmatmul.mubr.bf16.gmra.mxu1 %v4938_v17 }
 0x21e   :  { %3001 = vmatprep.mubr.bf16.mxu1 %v4939_v7 }
 0x225   :  { %3002 = vmatmul.mubr.bf16.gmra.mxu1 %v4940_v1  ;;  %v4943_v1 = vld [vmem:[#allocation28_spill] sm:$0xff] }
 0x226   :  { %3005 = vmatprep.mubr.bf16.mxu1 %v4941_v44  ;;  %v4820_v44 = vsub.s32 0, %v4943_v1 }
 0x22d   :  { %3006 = vmatmul.mubr.bf16.gmra.mxu1 %v4942_v4 }
 0x22e   :  { %3045 = vmatprep.mubr.bf16.mxu1 %v1542_v52 }
 0x272   :  { %v2883_v0 = vpop.f32.mrf.mxu1  ;;  %v1528_v2 = vpop.f32.mrf.mxu0 }
 0x273   :  { %3383 = vrcp.f32 %v2883_v0 }
 0x274   :  { %v697_v37 = vpop.f32.mrf.mxu1  ;;  %3385 = vrcp.f32 %v1528_v2  ;;  %v3027_v57 = vpop.f32.mrf.mxu0 }
 0x275   :  { %3387 = vrcp.f32 %v697_v37 }
 0x276   :  { %v2884_v63 = vpop.f32.mrf.mxu1  ;;  %v1531_v51 = vpop.f32.mrf.mxu0 }
 0x277   :  { %3389 = vrcp.f32 %v2884_v63 }
 0x278   :  { %v700_v15 = vpop.f32.mrf.mxu1  ;;  %v3028_v17 = vpop.f32.mrf.mxu0 }
 0x279   :  { %3391 = vrcp.f32 %v700_v15 }
 0x27d   :  { %v2887_v7 = vpop.f32.mrf.mxu1 }
 0x27e   :  { %3393 = vrcp.f32 %v2887_v7 }
 0x27f   :  { %v713_v4 = vpop.f32.mrf.mxu1 }
 0x280   :  { %v3384_v54 = vpop.eup %3383  ;;  %3395 = vrcp.f32 %v713_v4 }
 0x281   :  { %v3386_v52 = vpop.eup %3385  ;;  %v858_v24 = vmul.f32 0.17677669, %v3384_v54  ;;  %v2888_v0 = vpop.f32.mrf.mxu1 }
 0x282   :  { %v3388_v36 = vpop.eup %3387  ;;  %v4251_v2 = vrot.slane %v3386_v52, %v4820_v44  ;;  %3397 = vrcp.f32 %v2888_v0 }
 0x283   :  { %v890_v37 = vmul.f32 %v4103_v62, %v858_v24  ;;  %v856_v57 = vmul.f32 0.17677669, %v3388_v36  ;;  %v716_v63 = vpop.f32.mrf.mxu1 }
 0x284   :  { %v3390_v51 = vpop.eup %3389  ;;  %3399 = vrcp.f32 %v716_v63 }
 0x285   :  { %v888_v15 = vmul.f32 %v4091_v53, %v856_v57  ;;  %v859_v17 = vmul.f32 0.17677669, %v3390_v51  ;;  %v4256_v7 = vmul.f32 %v4251_v2, %v890_v37  ;;  %v2891_v54 = vpop.f32.mrf.mxu1 }
 0x286   :  { %v3392_v4 = vpop.eup %3391  ;;  %3401 = vrcp.f32 %v2891_v54 }
 0x287   :  { %4944 = vst [vmem:[#allocation12_spill] sm:$0xff] %v4256_v7  ;;  %v891_v48 = vmul.f32 %v4095_v56, %v859_v17  ;;  %v857_v52 = vmul.f32 0.17677669, %v3392_v4  ;;  %v729_v44 = vpop.f32.mrf.mxu1  ;;  %v4260_v0 = vmul.f32 %v4251_v2, %v888_v15  ;;  %v4274_v4 = vld [vmem:[#allocation7 + $0x38] sm:$0xff]  }
 0x288   :  { %3403 = vrcp.f32 %v729_v44  ;;  %3061 = vmatprep.subr.bf16.mxu0 %v4274_v4 }
 0x289   :  { %v4263_v62 = vmul.f32 %v4251_v2, %v891_v48  ;;  %v889_v53 = vmul.f32 %v4099_v20, %v857_v52  ;;  %v2892_v24 = vpop.f32.mrf.mxu1  ;;  %v4276_v52 = vld [vmem:[#allocation7 + $0x30] sm:$0xff]   ;;  %3062 = vmatpush3.bf16.msra.mxu0 %v4274_v4 }
 0x28a   :  { %3405 = vrcp.f32 %v2892_v24  ;;  %3063 = vmatprep.subr.bf16.mxu0 %v4276_v52 }
 0x28b   :  { %4945 = vst [vmem:[#allocation13_spill] sm:$0xff] %v4263_v62  ;;  %v3394_v36 = vpop.eup %3393  ;;  %v732_v57 = vpop.f32.mrf.mxu1  ;;  %v4269_v56 = vmul.f32 %v4251_v2, %v889_v53 }
 0x28c   :  { %v862_v63 = vmul.f32 0.17677669, %v3394_v36  ;;  %3407 = vrcp.f32 %v732_v57 }
 0x28d   :  { %v3396_v51 = vpop.eup %3395  ;;  %v2895_v15 = vpop.f32.mrf.mxu1  ;;  %3064 = vmatpush3.bf16.msra.mxu0 %v4276_v52 }
 0x28e   :  { %v894_v44 = vmul.f32 %v4125_v45, %v862_v63  ;;  %v860_v20 = vmul.f32 0.17677669, %v3396_v51  ;;  %3409 = vrcp.f32 %v2895_v15 }
 0x28f   :  { %v3398_v17 = vpop.eup %3397  ;;  %v745_v54 = vpop.f32.mrf.mxu1 }
 0x290   :  { %v892_v53 = vmul.f32 %v4116_v29, %v860_v20  ;;  %v863_v24 = vmul.f32 0.17677669, %v3398_v17  ;;  %3411 = vrcp.f32 %v745_v54  ;;  %v4280_v36 = vmul.f32 %v4251_v2, %v894_v44  ;;  %v4289_v20 = vld [vmem:[#allocation7 + $0x28] sm:$0xff]  }
 0x291   :  { %v3400_v57 = vpop.eup %3399  ;;  %v2896_v37 = vpop.f32.mrf.mxu1  ;;  %3065 = vmatprep.subr.bf16.mxu0 %v4289_v20 }
 0x292   :  { %4946 = vst [vmem:[#allocation14_spill] sm:$0xff] %v4280_v36  ;;  %v895_v45 = vmul.f32 %v4129_v43, %v863_v24  ;;  %v861_v63 = vmul.f32 0.17677669, %v3400_v57  ;;  %3413 = vrcp.f32 %v2896_v37  ;;  %v4286_v51 = vmul.f32 %v4251_v2, %v892_v53  ;;  %3066 = vmatpush3.bf16.msra.mxu0 %v4289_v20 }
 0x293   :  { %v3402_v15 = vpop.eup %3401  ;;  %v748_v29 = vpop.f32.mrf.mxu1 }
 0x294   :  { %4947 = vst [vmem:[#allocation15_spill] sm:$0xff] %v4286_v51  ;;  %v893_v44 = vmul.f32 %v4120_v18, %v861_v63  ;;  %v866_v17 = vmul.f32 0.17677669, %v3402_v15  ;;  %3415 = vrcp.f32 %v748_v29  ;;  %v4293_v54 = vmul.f32 %v4251_v2, %v895_v45  ;;  %v4305_v18 = vld [vmem:[#allocation7 + $0x20] sm:$0xff]  }
 0x295   :  { %v3404_v43 = vpop.eup %3403  ;;  %v4295_v37 = vpop.f32.mrf.mxu1  ;;  %3067 = vmatprep.subr.bf16.mxu0 %v4305_v18 }
 0x296   :  { %4948 = vst [vmem:[#allocation16_spill] sm:$0xff] %v4293_v54  ;;  %v898_v24 = vmul.f32 %v4142_v28, %v866_v17  ;;  %v864_v53 = vmul.f32 0.17677669, %v3404_v43  ;;  %v4300_v57 = vmul.f32 %v4251_v2, %v893_v44  ;;  %3068 = vmatpush3.bf16.msra.mxu0 %v4305_v18 }
 0x297   :  { %v3406_v48 = vpop.eup %3405  ;;  %v4302_v7 = vpop.f32.mrf.mxu1 }
 0x298   :  { %4949 = vst [vmem:[#allocation17_spill] sm:$0xff] %v4300_v57  ;;  %v896_v63 = vmul.f32 %v4134_v39, %v864_v53  ;;  %v867_v15 = vmul.f32 0.17677669, %v3406_v48  ;;  %v4315_v44 = vmul.f32 %v4251_v2, %v898_v24  ;;  %v4325_v48 = vld [vmem:[#allocation7 + $0x18] sm:$0xff]  }
 0x299   :  { %v3408_v29 = vpop.eup %3407  ;;  %v4312_v17 = vpop.f32.mrf.mxu1  ;;  %3069 = vmatprep.subr.bf16.mxu0 %v4325_v48 }
 0x29a   :  { %4950 = vst [vmem:[#allocation18_spill] sm:$0xff] %v4315_v44  ;;  %v899_v43 = vmul.f32 %v4146_v61, %v867_v15  ;;  %v865_v62 = vmul.f32 0.17677669, %v3408_v29  ;;  %v4320_v1 = vmul.f32 %v4251_v2, %v896_v63  ;;  %3070 = vmatpush3.bf16.msra.mxu0 %v4325_v48 }
 0x29b   :  { %v3410_v45 = vpop.eup %3409  ;;  %v4322_v39 = vpop.f32.mrf.mxu1 }
 0x29c   :  { %4951 = vst [vmem:[#allocation19_spill] sm:$0xff] %v4320_v1  ;;  %v897_v53 = vmul.f32 %v4138_v14, %v865_v62  ;;  %v870_v28 = vmul.f32 0.17677669, %v3410_v45  ;;  %v4329_v24 = vmul.f32 %v4251_v2, %v899_v43  ;;  %v4341_v14 = vld [vmem:[#allocation7 + $0x10] sm:$0xff]  }
 0x29d   :  { %v3412_v61 = vpop.eup %3411  ;;  %v4331_v15 = vpop.f32.mrf.mxu1  ;;  %3071 = vmatprep.subr.bf16.mxu0 %v4341_v14 }
 0x29e   :  { %4952 = vst [vmem:[#allocation20_spill] sm:$0xff] %v4329_v24  ;;  %v902_v29 = vmul.f32 %v4158_v38, %v870_v28  ;;  %v868_v63 = vmul.f32 0.17677669, %v3412_v61  ;;  %v4336_v36 = vmul.f32 %v4251_v2, %v897_v53  ;;  %3072 = vmatpush3.bf16.msra.mxu0 %v4341_v14 }
 0x29f   :  { %v3414_v54 = vpop.eup %3413  ;;  %v4338_v51 = vpop.f32.mrf.mxu1 }
 0x2a0   :  { %4953 = vst [vmem:[#allocation21_spill] sm:$0xff] %v4336_v36  ;;  %v900_v45 = vmul.f32 %v4150_v25, %v868_v63  ;;  %v871_v43 = vmul.f32 0.17677669, %v3414_v54  ;;  %v4351_v53 = vmul.f32 %v4251_v2, %v902_v29 }
 0x2a1   :  { %v3416_v28 = vpop.eup %3415  ;;  %v4348_v61 = vpop.f32.mrf.mxu1 }
 0x2a2   :  { %4954 = vst [vmem:[#allocation22_spill] sm:$0xff] %v4351_v53  ;;  %v903_v57 = vmul.f32 %v4162_v10, %v871_v43  ;;  %v869_v46 = vmul.f32 0.17677669, %v3416_v28  ;;  %v4356_v30 = vmul.f32 %v4251_v2, %v900_v45 }
 0x2a3   :  { %v4358_v62 = vpop.f32.mrf.mxu1 }
 0x2a4   :  { %4955 = vst [vmem:[#allocation23_spill] sm:$0xff] %v4356_v30  ;;  %v901_v25 = vmul.f32 %v4154_v16, %v869_v46  ;;  %v4363_v54 = vmul.f32 %v4251_v2, %v903_v57 }
 0x2a5   :  { %v4365_v63 = vpop.f32.mrf.mxu1 }
 0x2a6   :  { %4956 = vst [vmem:[#allocation24_spill] sm:$0xff] %v4363_v54  ;;  %v4369_v10 = vmul.f32 %v4251_v2, %v901_v25 }
 0x2a7   :  { %v4371_v29 = vpop.f32.mrf.mxu1 }
 0x2a8   :  { %4957 = vst [vmem:[#allocation25_spill] sm:$0xff] %v4369_v10  ;;  %4958 = vst [vmem:[#allocation26_spill] sm:$0xff] %v4371_v29 }
 0x2a9   :  { %v4377_v28 = vpop.f32.mrf.mxu1 }
 0x2aa   :  { %4959 = vst [vmem:[#allocation27_spill] sm:$0xff] %v4377_v28 }
 0x2ab   :  { %v4379_v16 = vpop.f32.mrf.mxu1 }
 0x2ac   :  { %4960 = vst [vmem:[#allocation53_spill] sm:$0xff] %v4379_v16 }
 0x2ad   :  { %v4381_v46 = vpop.f32.mrf.mxu1 }
 0x2ae   :  { %4961 = vst [vmem:[#allocation54_spill] sm:$0xff] %v4381_v46 }
 0x2af   :  { %v4383_v57 = vpop.f32.mrf.mxu1 }
 0x2b0   :  { %4962 = vst [vmem:[#allocation55_spill] sm:$0xff] %v4383_v57 }
 0x2b1   :  { %v4385_v38 = vpop.f32.mrf.mxu1 }
 0x2b2   :  { %4963 = vst [vmem:[#allocation56_spill] sm:$0xff] %v4385_v38 }
 0x2b3   :  { %v4387_v2 = vpop.f32.mrf.mxu1 }
 0x2b4   :  { %4964 = vst [vmem:[#allocation57_spill] sm:$0xff] %v4387_v2 }
 0x2b5   :  { %v4389_v25 = vpop.f32.mrf.mxu1 }
 0x2b7   :  { %v4391_v44 = vpop.f32.mrf.mxu1 }
 0x2b9   :  { %v2980_v45 = vpop.f32.mrf.mxu1 }
 0x2bb   :  { %v4393_v53 = vpop.f32.mrf.mxu1 }
 0x2bd   :  { %v2983_v43 = vpop.f32.mrf.mxu1 }
 0x2bf   :  { %v1273_v54 = vpop.f32.mrf.mxu1 }
 0x2c1   :  { %v2984_v30 = vpop.f32.mrf.mxu1 }
 0x2c3   :  { %v1276_v10 = vpop.f32.mrf.mxu1 }
 0x2c5   :  { %v2987_v24 = vpop.f32.mrf.mxu1 }
 0x2c6   :  { %v1298_v28 = vadd.f32 %v2987_v24, %v4398_v33 }
 0x2c7   :  { %v1289_v1 = vpop.f32.mrf.mxu1 }
 0x2c9   :  { %v2988_v36 = vpop.f32.mrf.mxu1 }
 0x2ca   :  { %v1301_v38 = vadd.f32 %v2988_v36, %v4398_v33  ;;  %v1285_v36 = vadd.f32 %v2984_v30, %v4398_v33 }
 0x2cb   :  { %v1292_v35 = vpop.f32.mrf.mxu1 }
 0x2cc   :  { %v1389_v29 = vpack.c.bf16 %v1301_v38, %v1298_v28  ;;  %v1282_v28 = vadd.f32 %v2983_v43, %v4398_v33  ;;  %v1269_v43 = vadd.f32 %v2980_v45, %v4398_v33 }
 0x2cd   :  { %v2991_v11 = vpop.f32.mrf.mxu1 }
 0x2ce   :  { %v1314_v58 = vadd.f32 %v2991_v11, %v4398_v33 }
 0x2cf   :  { %v1305_v6 = vpop.f32.mrf.mxu1 }
 0x2d0   :  { %v1306_v3 = vadd.f32 %v4398_v33, %v1305_v6 }
 0x2d1   :  { %v2992_v12 = vpop.f32.mrf.mxu1 }
 0x2d2   :  { %v1317_v26 = vadd.f32 %v2992_v12, %v4398_v33 }
 0x2d3   :  { %v1308_v13 = vpop.f32.mrf.mxu1 }
 0x2d4   :  { %v1391_v49 = vpack.c.bf16 %v1317_v26, %v1314_v58  ;;  %v1309_v9 = vadd.f32 %v4398_v33, %v1308_v13  ;;  %v1293_v58 = vadd.f32 %v4398_v33, %v1292_v35 }
 0x2d5   :  { %v2995_v2 = vpop.f32.mrf.mxu1 }
 0x2d6   :  { %v1390_v57 = vpack.c.bf16 %v1309_v9, %v1306_v3  ;;  %3029 = vmatprep.subr.bf16.mxu1 %v1391_v49  ;;  %v1330_v46 = vadd.f32 %v2995_v2, %v4398_v33  ;;  %v1290_v9 = vadd.f32 %v4398_v33, %v1289_v1  ;;  %v1277_v2 = vadd.f32 %v4398_v33, %v1276_v10 }
 0x2d7   :  { %3030 = vmatpush3.bf16.msra.mxu1 %v1391_v49  ;;  %v1321_v16 = vpop.f32.mrf.mxu1 }
 0x2d8   :  { %3031 = vmatprep.subr.bf16.mxu1 %v1390_v57  ;;  %v1322_v12 = vadd.f32 %v4398_v33, %v1321_v16  ;;  %v1388_v24 = vpack.c.bf16 %v1293_v58, %v1290_v9  ;;  %v1543_v9 = vpop.trf.xlu0 }
 0x2d9   :  { %v2996_v11 = vpop.f32.mrf.mxu1 }
 0x2da   :  { %v1333_v13 = vadd.f32 %v2996_v11, %v4398_v33 }
 0x2db   :  { %3032 = vmatpush3.bf16.msra.mxu1 %v1390_v57  ;;  %v1324_v26 = vpop.f32.mrf.mxu1 }
 0x2dc   :  { %3033 = vmatprep.subr.bf16.mxu1 %v1389_v29  ;;  %v4411_v3 = vpack.c.bf16 %v1333_v13, %v1330_v46  ;;  %v1325_v49 = vadd.f32 %v4398_v33, %v1324_v26  ;;  %v1387_v46 = vpack.c.bf16 %v1285_v36, %v1282_v28  ;;  %v1266_v36 = vadd.f32 %v4389_v25, %v4398_v33 }
 0x2dd   :  { %v2999_v6 = vpop.f32.mrf.mxu1 }
 0x2de   :  { %v4415_v16 = vpack.c.bf16 %v1325_v49, %v1322_v12  ;;  %v1346_v38 = vadd.f32 %v2999_v6, %v4398_v33  ;;  %v1274_v12 = vadd.f32 %v4398_v33, %v1273_v54 }
 0x2df   :  { %3034 = vmatpush3.bf16.msra.mxu1 %v1389_v29  ;;  %v1337_v35 = vpop.f32.mrf.mxu1 }
 0x2e0   :  { %3035 = vmatprep.subr.bf16.mxu1 %v1388_v24  ;;  %v1338_v1 = vadd.f32 %v4398_v33, %v1337_v35  ;;  %v1386_v26 = vpack.c.bf16 %v1277_v2, %v1274_v12  ;;  %v1261_v35 = vadd.f32 %v4398_v33, %v4393_v53 }
 0x2e1   :  { %v3000_v57 = vpop.f32.mrf.mxu1 }
 0x2e2   :  { %v1349_v11 = vadd.f32 %v3000_v57, %v4398_v33  ;;  %v1544_v57 = vpop.trf.xlu0 }
 0x2e3   :  { %3036 = vmatpush3.bf16.msra.mxu1 %v1388_v24  ;;  %v1340_v30 = vpop.f32.mrf.mxu1 }
 0x2e4   :  { %3037 = vmatprep.subr.bf16.mxu1 %v1387_v46  ;;  %v4423_v58 = vpack.c.bf16 %v1349_v11, %v1346_v38  ;;  %v1341_v29 = vadd.f32 %v4398_v33, %v1340_v30  ;;  %v1385_v38 = vpack.c.bf16 %v1269_v43, %v1266_v36 }
 0x2e5   :  { %v3003_v13 = vpop.f32.mrf.mxu1 }
 0x2e6   :  { %v4427_v49 = vpack.c.bf16 %v1341_v29, %v1338_v1  ;;  %v1362_v10 = vadd.f32 %v3003_v13, %v4398_v33  ;;  %v1258_v1 = vadd.f32 %v4398_v33, %v4391_v44  ;;  %v1545_v43 = vpop.trf.xlu0 }
 0x2e7   :  { %3038 = vmatpush3.bf16.msra.mxu1 %v1387_v46  ;;  %v1353_v6 = vpop.f32.mrf.mxu1 }
 0x2e8   :  { %3039 = vmatprep.subr.bf16.mxu1 %v1386_v26  ;;  %v1354_v54 = vadd.f32 %v4398_v33, %v1353_v6  ;;  %v1384_v11 = vpack.c.bf16 %v1261_v35, %v1258_v1 }
 0x2e9   :  { %v3004_v24 = vpop.f32.mrf.mxu1 }
 0x2ea   :  { %v1365_v45 = vadd.f32 %v3004_v24, %v4398_v33 }
 0x2eb   :  { %3040 = vmatpush3.bf16.msra.mxu1 %v1386_v26  ;;  %v1356_v28 = vpop.f32.mrf.mxu1 }
 0x2ec   :  { %3041 = vmatprep.subr.bf16.mxu1 %v1385_v38  ;;  %v4438_v46 = vpack.c.bf16 %v1365_v45, %v1362_v10  ;;  %v1357_v25 = vadd.f32 %v4398_v33, %v1356_v28  ;;  %v4965_v45 = vpack.c.bf16 %v4269_v56, %v4260_v0  ;;  %v1987_v28 = vrot.slane %v4237_v55, 4 }
 0x2ed   :  { %v3007_v2 = vpop.f32.mrf.mxu1 }
 0x2ee   :  { %v4441_v30 = vpack.c.bf16 %v1357_v25, %v1354_v54  ;;  %v1378_v12 = vadd.f32 %v3007_v2, %v4398_v33  ;;  %v1546_v54 = vpop.trf.xlu0 }
 0x2ef   :  { %3042 = vmatpush3.bf16.msra.mxu1 %v1385_v38  ;;  %v1369_v53 = vpop.f32.mrf.mxu1 }
 0x2f0   :  { %3043 = vmatprep.subr.bf16.mxu1 %v1384_v11  ;;  %v1370_v29 = vadd.f32 %v4398_v33, %v1369_v53 }
 0x2f1   :  { %v3008_v13 = vpop.f32.mrf.mxu1 }
 0x2f2   :  { %v1381_v44 = vadd.f32 %v3008_v13, %v4398_v33  ;;  %v1547_v24 = vpop.trf.xlu0  ;;  %v4470_v13 = vld [vmem:[#allocation7 + $0x8] sm:$0xff]  }
 0x2f3   :  { %3044 = vmatpush3.bf16.msra.mxu1 %v1384_v11  ;;  %v1372_v26 = vpop.f32.mrf.mxu1  ;;  %3073 = vmatprep.subr.bf16.mxu0 %v4470_v13 }
 0x2f4   :  { %v4446_v10 = vpack.c.bf16 %v1381_v44, %v1378_v12  ;;  %v1373_v6 = vadd.f32 %v4398_v33, %v1372_v26  ;;  %v1988_v33 = vmax.f32 %v4237_v55, %v1987_v28  ;;  %3074 = vmatpush3.bf16.msra.mxu0 %v4470_v13  ;;  %v4478_v26 = vld [vmem:[#allocation7] sm:$0xff]  }
 0x2f5   :  { %3075 = vmatprep.subr.bf16.mxu0 %v4478_v26 }
 0x2f6   :  { %3046 = vmatmul.mubr.bf16.vlgmr.msra.gmra.mxu1 %v1543_v9  ;;  %v4449_v36 = vpack.c.bf16 %v1373_v6, %v1370_v29  ;;  %v1548_v38 = vpop.trf.xlu0  ;;  %v1989_v9 = vrot.slane %v1988_v33, 2 }
 0x2f7   :  { %3049 = vmatprep.mubr.bf16.mxu1 %v1544_v57 }
 0x2f8   :  { %v1990_v1 = vmax.f32 %v1988_v33, %v1989_v9  ;;  %3076 = vmatpush3.bf16.msra.mxu0 %v4478_v26 }
 0x2f9   :  { %3125 = vmatprep.subr.bf16.mxu0 %v4900_v47 }
 0x2fa   :  { %v1549_v35 = vpop.trf.xlu0  ;;  %v1991_v57 = vrot.slane %v1990_v1, 1 }
 0x2fc   :  { %v4456_v25 = vmax.f32 %v1990_v1, %v1991_v57 }
 0x2fe   :  { %3050 = vmatmul.mubr.bf16.gmra.mxu1 %v1545_v43  ;;  %v2006_v2 = vsub.f32 %v4227_v34, %v4456_v25  ;;  %v2007_v11 = vsub.f32 %v4077_v21, %v4456_v25  ;;  %v2008_v12 = vsub.f32 %v4089_v50, %v4456_v25  ;;  %v2005_v55 = vsub.f32 %v4082_v27, %v4456_v25 }
 0x2ff   :  { %3053 = vmatprep.mubr.bf16.mxu1 %v1546_v54  ;;  %v2003_v34 = vsub.f32 %v4050_v40, %v4456_v25  ;;  %v2004_v21 = vsub.f32 %v4064_v8, %v4456_v25  ;;  %v2001_v27 = vsub.f32 %v4056_v19, %v4456_v25  ;;  %v2002_v44 = vsub.f32 %v4069_v5, %v4456_v25 }
 0x300   :  { %v2035_v0 = vmul.f32 1.442695, %v2006_v2  ;;  %v2037_v56 = vmul.f32 1.442695, %v2007_v11  ;;  %v2039_v53 = vmul.f32 1.442695, %v2008_v12  ;;  %v1999_v6 = vsub.f32 %v4010_v59, %v4456_v25 }
 0x301   :  { %v2033_v29 = vmul.f32 1.442695, %v2005_v55  ;;  %v2029_v50 = vmul.f32 1.442695, %v2003_v34  ;;  %v2031_v43 = vmul.f32 1.442695, %v2004_v21  ;;  %v2000_v54 = vsub.f32 %v4032_v60, %v4456_v25 }
 0x302   :  { %3417 = vpow2.f32 %v2037_v56  ;;  %v2025_v40 = vmul.f32 1.442695, %v2001_v27  ;;  %v2027_v8 = vmul.f32 1.442695, %v2002_v44  ;;  %v1997_v28 = vsub.f32 %v4022_v31, %v4456_v25 }
 0x303   :  { %3419 = vpow2.f32 %v2039_v53  ;;  %v1998_v33 = vsub.f32 %v4042_v22, %v4456_v25  ;;  %v1995_v57 = vsub.f32 %v4004_v41, %v4456_v25  ;;  %v1996_v2 = vsub.f32 %v4017_v23, %v4456_v25 }
 0x304   :  { %3421 = vpow2.f32 %v2035_v0  ;;  %v2017_v60 = vmul.f32 1.442695, %v1997_v28  ;;  %v1993_v22 = vsub.f32 %v4007_v32, %v4456_v25  ;;  %v1994_v53 = vsub.f32 %v4027_v42, %v4456_v25 }
 0x305   :  { %3423 = vpow2.f32 %v2033_v29  ;;  %v2019_v1 = vmul.f32 1.442695, %v1998_v33  ;;  %v2013_v0 = vmul.f32 1.442695, %v1995_v57  ;;  %v2015_v31 = vmul.f32 1.442695, %v1996_v2 }
 0x306   :  { %3054 = vmatmul.mubr.bf16.gmra.mxu1 %v1547_v24  ;;  %3425 = vpow2.f32 %v2029_v50  ;;  %v2021_v24 = vmul.f32 1.442695, %v1999_v6  ;;  %v2009_v41 = vmul.f32 1.442695, %v1993_v22  ;;  %v2011_v34 = vmul.f32 1.442695, %v1994_v53 }
 0x307   :  { %3057 = vmatprep.mubr.bf16.mxu1 %v1548_v38  ;;  %3427 = vpow2.f32 %v2031_v43  ;;  %v2023_v38 = vmul.f32 1.442695, %v2000_v54 }
 0x308   :  { %3429 = vpow2.f32 %v2025_v40 }
 0x309   :  { %3431 = vpow2.f32 %v2027_v8 }
 0x30a   :  { %3433 = vpow2.f32 %v2021_v24 }
 0x30b   :  { %3435 = vpow2.f32 %v2023_v38 }
 0x30c   :  { %3437 = vpow2.f32 %v2017_v60 }
 0x30d   :  { %3439 = vpow2.f32 %v2019_v1 }
 0x30e   :  { %3058 = vmatmul.mubr.bf16.gmra.mxu1 %v1549_v35  ;;  %3441 = vpow2.f32 %v2013_v0 }
 0x30f   :  { %3109 = vmatprep.mubr.bf16.mxu1 %v4965_v45  ;;  %v3418_v19 = vpop.eup %3417  ;;  %3443 = vpow2.f32 %v2015_v31 }
 0x310   :  { %v3420_v5 = vpop.eup %3419  ;;  %3445 = vpow2.f32 %v2009_v41 }
 0x311   :  { %v3422_v35 = vpop.eup %3421  ;;  %v2048_v45 = vpack.c.bf16 %v3420_v5, %v3418_v19  ;;  %3447 = vpow2.f32 %v2011_v34 }
 0x312   :  { %v3424_v59 = vpop.eup %3423  ;;  %3449 = vrcp.f32 %v4295_v37 }
 0x313   :  { %v2047_v9 = vpack.c.bf16 %v3422_v35, %v3424_v59  ;;  %v3426_v11 = vpop.eup %3425  ;;  %3451 = vrcp.f32 %v4302_v7  ;;  %v4975_v7 = vld [vmem:[#allocation26_spill] sm:$0xff] }
 0x314   :  { %v3428_v12 = vpop.eup %3427  ;;  %3453 = vrcp.f32 %v4312_v17  ;;  %v4977_v17 = vld [vmem:[#allocation53_spill] sm:$0xff] }
 0x315   :  { %v2046_v56 = vpack.c.bf16 %v3428_v12, %v3426_v11  ;;  %v3430_v55 = vpop.eup %3429  ;;  %3455 = vrcp.f32 %v4322_v39 }
 0x316   :  { %v3432_v29 = vpop.eup %3431  ;;  %3457 = vrcp.f32 %v4331_v15 }
 0x317   :  { %v2045_v21 = vpack.c.bf16 %v3432_v29, %v3430_v55  ;;  %v3434_v23 = vpop.eup %3433  ;;  %3459 = vrcp.f32 %v4338_v51  ;;  %v4979_v51 = vld [vmem:[#allocation55_spill] sm:$0xff] }
 0x318   :  { %v3436_v50 = vpop.eup %3435  ;;  %3461 = vrcp.f32 %v4348_v61 }
 0x319   :  { %v2044_v43 = vpack.c.bf16 %v3436_v50, %v3434_v23  ;;  %v3438_v27 = vpop.eup %3437  ;;  %3463 = vrcp.f32 %v4358_v62 }
 0x31a   :  { %v3440_v44 = vpop.eup %3439  ;;  %3465 = vrcp.f32 %v4365_v63 }
 0x31b   :  { %v2043_v40 = vpack.c.bf16 %v3440_v44, %v3438_v27  ;;  %v3442_v8 = vpop.eup %3441  ;;  %3467 = vrcp.f32 %v4975_v7 }
 0x31c   :  { %v3444_v6 = vpop.eup %3443 }
 0x31d   :  { %v2042_v32 = vpack.c.bf16 %v3444_v6, %v3442_v8  ;;  %v3446_v54 = vpop.eup %3445 }
 0x31e   :  { %v3448_v19 = vpop.eup %3447 }
 0x31f   :  { %v2041_v42 = vpack.c.bf16 %v3448_v19, %v3446_v54  ;;  %v4976_v54 = vld [vmem:[#allocation27_spill] sm:$0xff]  ;;  %v4978_v19 = vld [vmem:[#allocation54_spill] sm:$0xff]  ;;  %v3450_v15 = vpop.eup %3449 }
 0x320   :  { %3469 = vrcp.f32 %v4976_v54  ;;  %v3452_v61 = vpop.eup %3451 }
 0x321   :  { %2089 = vxpose.xlu1.c.b16.start [1/8] %v2041_v42, 128  ;;  %3471 = vrcp.f32 %v4977_v17  ;;  %v3454_v62 = vpop.eup %3453 }
 0x322   :  { %3473 = vrcp.f32 %v4978_v19  ;;  %v875_v7 = vmul.f32 0.17677669, %v3454_v62 }
 0x323   :  { %3475 = vrcp.f32 %v4979_v51 }
 0x325   :  { %2090 = vxpose.xlu1.c.b16.cont [2/8] %v2042_v32, 128 }
 0x329   :  { %2091 = vxpose.xlu1.c.b16.cont [3/8] %v2043_v40, 128 }
 0x32d   :  { %2092 = vxpose.xlu1.c.b16.cont [4/8] %v2044_v43, 128 }
 0x331   :  { %2093 = vxpose.xlu1.c.b16.cont [5/8] %v2045_v21, 128 }
 0x335   :  { %2094 = vxpose.xlu1.c.b16.cont [6/8] %v2046_v56, 128 }
 0x339   :  { %2095 = vxpose.xlu1.c.b16.cont [7/8] %v2047_v9, 128 }
 0x33d   :  { %2096 = vxpose.xlu1.c.b16.end [8/8] %v2048_v45, 128 }
 0x3b6   :  { %v3047_v25 = vpop.f32.mrf.mxu1 }
 0x3b8   :  { %v1584_v5 = vpop.f32.mrf.mxu1 }
 0x3ba   :  { %v3048_v24 = vpop.f32.mrf.mxu1 }
 0x3bb   :  { %v2562_v28 = vpack.c.bf16 %v3048_v24, %v3047_v25  ;;  %v4980_v25 = vld [vmem:[#allocation56_spill] sm:$0xff]  ;;  %v3456_v24 = vpop.eup %3455 }
 0x3bc   :  { %v1587_v38 = vpop.f32.mrf.mxu1  ;;  %3477 = vrcp.f32 %v4980_v25  ;;  %v873_v54 = vmul.f32 0.17677669, %v3456_v24 }
 0x3bd   :  { %v2559_v35 = vpack.c.bf16 %v1587_v38, %v1584_v5  ;;  %v4981_v5 = vld [vmem:[#allocation57_spill] sm:$0xff] }
 0x3be   :  { %v3051_v33 = vpop.f32.mrf.mxu1  ;;  %3479 = vrcp.f32 %v4981_v5 }
 0x3bf   :  { %3077 = vmatprep.mubr.msk.bf16.mxu0 %vm3869_vm10, %v2559_v35  ;;  %v3458_v35 = vpop.eup %3457 }
 0x3c0   :  { %v1600_v60 = vpop.f32.mrf.mxu1  ;;  %3078 = vmatmul.mubr.msk.bf16.vlgmr.msra.gmra.mxu0 %vm3847_vm6, %v2562_v28  ;;  %v878_v17 = vmul.f32 0.17677669, %v3458_v35 }
 0x3c1   :  { %3126 = vmatpush3.bf16.msra.mxu0 %v2048_v45 }
 0x3c2   :  { %v3052_v57 = vpop.f32.mrf.mxu1  ;;  %3127 = vmatprep.subr.bf16.mxu0 %v4900_v47 }
 0x3c3   :  { %v2568_v12 = vpack.c.bf16 %v3052_v57, %v3051_v33  ;;  %v3460_v33 = vpop.eup %3459 }
 0x3c4   :  { %v1603_v2 = vpop.f32.mrf.mxu1  ;;  %v3462_v57 = vpop.eup %3461  ;;  %v876_v19 = vmul.f32 0.17677669, %v3460_v33 }
 0x3c5   :  { %v2565_v11 = vpack.c.bf16 %v1603_v2, %v1600_v60  ;;  %3128 = vmatpush3.bf16.msra.mxu0 %v2047_v9  ;;  %v879_v51 = vmul.f32 0.17677669, %v3462_v57 }
 0x3c6   :  { %v3055_v0 = vpop.f32.mrf.mxu1  ;;  %3129 = vmatprep.subr.bf16.mxu0 %v4900_v47 }
 0x3c7   :  { %3081 = vmatprep.mubr.msk.bf16.mxu0 %vm3829_vm1, %v2565_v11  ;;  %v3464_v11 = vpop.eup %3463 }
 0x3c8   :  { %v1616_v22 = vpop.f32.mrf.mxu1  ;;  %3082 = vmatmul.mubr.msk.bf16.gmra.mxu0 %vm3805_vm14, %v2568_v12  ;;  %v3466_v12 = vpop.eup %3465 }
 0x3c9   :  { %3130 = vmatpush3.bf16.msra.mxu0 %v2046_v56  ;;  %v882_v25 = vmul.f32 0.17677669, %v3466_v12  ;;  %v4987_v12 = vld [vmem:[#allocation40_spill] sm:$0xff] }
 0x3ca   :  { %v3056_v55 = vpop.f32.mrf.mxu1  ;;  %3131 = vmatprep.subr.bf16.mxu0 %v4900_v47 }
 0x3cb   :  { %v2574_v41 = vpack.c.bf16 %v3056_v55, %v3055_v0 }
 0x3cc   :  { %v1619_v45 = vpop.f32.mrf.mxu1 }
 0x3cd   :  { %v2571_v29 = vpack.c.bf16 %v1619_v45, %v1616_v22  ;;  %3132 = vmatpush3.bf16.msra.mxu0 %v2045_v21  ;;  %v3468_v22 = vpop.eup %3467 }
 0x3ce   :  { %v3059_v9 = vpop.f32.mrf.mxu1  ;;  %3133 = vmatprep.subr.bf16.mxu0 %v4900_v47  ;;  %v3470_v45 = vpop.eup %3469  ;;  %v880_v5 = vmul.f32 0.17677669, %v3468_v22  ;;  %v4988_v22 = vld [vmem:[#allocation45_spill] sm:$0xff] }
 0x3cf   :  { %3085 = vmatprep.mubr.msk.bf16.mxu0 %vm3783_vm11, %v2571_v29 }
 0x3d0   :  { %v1632_v23 = vpop.f32.mrf.mxu1  ;;  %3086 = vmatmul.mubr.msk.bf16.gmra.mxu0 %vm3761_vm8, %v2574_v41  ;;  %v3472_v41 = vpop.eup %3471 }
 0x3d1   :  { %3134 = vmatpush3.bf16.msra.mxu0 %v2044_v43  ;;  %v4974_v43 = vmov 1065369472  }
 0x3d2   :  { %v3060_v27 = vpop.f32.mrf.mxu1  ;;  %3135 = vmatprep.subr.bf16.mxu0 %v4900_v47 }
 0x3d3   :  { %v2580_v8 = vpack.c.bf16 %v3060_v27, %v3059_v9  ;;  %v3474_v9 = vpop.eup %3473 }
 0x3d4   :  { %v1635_v56 = vpop.f32.mrf.mxu1 }
 0x3d5   :  { %v2577_v44 = vpack.c.bf16 %v1635_v56, %v1632_v23  ;;  %3136 = vmatpush3.bf16.msra.mxu0 %v2043_v40  ;;  %v874_v23 = vmul.f32 0.17677669, %v3450_v15  ;;  %v3476_v56 = vpop.eup %3475  ;;  %v4983_v15 = vld [vmem:[#allocation37_spill] sm:$0xff] }
 0x3d6   :  { %3137 = vmatprep.subr.bf16.mxu0 %v4900_v47  ;;  %v884_v24 = vmul.f32 0.17677669, %v3476_v56 }
 0x3d7   :  { %3089 = vmatprep.mubr.msk.bf16.mxu0 %vm3740_vm5, %v2577_v44  ;;  %v872_v44 = vmul.f32 0.17677669, %v3452_v61  ;;  %v886_v61 = vmul.f32 0.17677669, %v3474_v9  ;;  %v4990_v9 = vld [vmem:[#allocation47_spill] sm:$0xff] }
 0x3d8   :  { %3090 = vmatmul.mubr.msk.bf16.gmra.mxu0 %vm3718_vm2, %v2580_v8 }
 0x3d9   :  { %3138 = vmatpush3.bf16.msra.mxu0 %v2042_v32  ;;  %3141 = vmatprep.mubr.msk.bf16.mxu0 %vm3580_vm12, %v4900_v47 }
 0x3da   :  { %3139 = vmatprep.subr.bf16.mxu0 %v4900_v47 }
 0x3dd   :  { %3140 = vmatpush3.bf16.msra.mxu0 %v2041_v42 }
 0x3de   :  { %3177 = vmatprep.subr.bf16.mxu0 %v4274_v4 }
 0x3e0   :  { %3142 = vmatmul.mubr.bf16.vlgmr.msra.gmra.mxu0 %v4974_v43  ;;  %v3478_v43 = vpop.eup %3477 }
 0x3e1   :  { %3178 = vmatpush3.bf16.msra.mxu0 %v4274_v4  ;;  %v887_v35 = vmul.f32 0.17677669, %v3478_v43  ;;  %v4994_v43 = vld [vmem:[#allocation51_spill] sm:$0xff] }
 0x3e2   :  { %3179 = vmatprep.subr.bf16.mxu0 %v4276_v52 }
 0x3e5   :  { %3180 = vmatpush3.bf16.msra.mxu0 %v4276_v52 }
 0x3e6   :  { %3181 = vmatprep.subr.bf16.mxu0 %v4289_v20 }
 0x3e9   :  { %3182 = vmatpush3.bf16.msra.mxu0 %v4289_v20 }
 0x3ea   :  { %3183 = vmatprep.subr.bf16.mxu0 %v4305_v18 }
 0x3ed   :  { %3184 = vmatpush3.bf16.msra.mxu0 %v4305_v18 }
 0x3ee   :  { %3185 = vmatprep.subr.bf16.mxu0 %v4325_v48 }
 0x3f1   :  { %3186 = vmatpush3.bf16.msra.mxu0 %v4325_v48 }
 0x3f2   :  { %3187 = vmatprep.subr.bf16.mxu0 %v4341_v14 }
 0x3f5   :  { %3188 = vmatpush3.bf16.msra.mxu0 %v4341_v14 }
 0x3f6   :  { %3189 = vmatprep.subr.bf16.mxu0 %v4470_v13 }
 0x3f9   :  { %3190 = vmatpush3.bf16.msra.mxu0 %v4470_v13 }
 0x3fa   :  { %3191 = vmatprep.subr.bf16.mxu0 %v4478_v26 }
 0x3fd   :  { %3192 = vmatpush3.bf16.msra.mxu0 %v4478_v26 }
 0x480   :  { %v4541_v47 = vpop.f32.mrf.mxu0 }
 0x482   :  { %v4543_v4 = vpop.f32.mrf.mxu0 }
 0x484   :  { %v4545_v52 = vpop.f32.mrf.mxu0 }
 0x486   :  { %v4547_v20 = vpop.f32.mrf.mxu0 }
 0x488   :  { %v4549_v18 = vpop.f32.mrf.mxu0 }
 0x48a   :  { %v4551_v48 = vpop.f32.mrf.mxu0 }
 0x48c   :  { %v4553_v14 = vpop.f32.mrf.mxu0 }
 0x48e   :  { %v4557_v13 = vpop.f32.mrf.mxu0 }
 0x490   :  { %v3087_v26 = vpop.f32.mrf.mxu0 }
 0x492   :  { %v1785_v40 = vpop.f32.mrf.mxu0 }
 0x494   :  { %v3088_v32 = vpop.f32.mrf.mxu0 }
 0x495   :  { %v1821_v55 = vpack.c.bf16 %v3088_v32, %v3087_v26  ;;  %v877_v26 = vmul.f32 0.17677669, %v3464_v11  ;;  %v4982_v32 = vld [vmem:[#allocation39_spill] sm:$0xff] }
 0x496   :  { %v1788_v37 = vpop.f32.mrf.mxu0 }
 0x497   :  { %v1820_v8 = vpack.c.bf16 %v1788_v37, %v1785_v40  ;;  %v1819_v40 = vpack.c.bf16 %v4553_v14, %v4549_v18  ;;  %v4984_v37 = vld [vmem:[#allocation41_spill] sm:$0xff]  ;;  %v914_v18 = vmul.f32 %v4990_v9, %v882_v25  ;;  %v4991_v14 = vld [vmem:[#allocation44_spill] sm:$0xff] }
 0x498   :  { %v3091_v39 = vpop.f32.mrf.mxu0  ;;  %v907_v62 = vmul.f32 %v4984_v37, %v875_v7  ;;  %v918_v7 = vmul.f32 %v4994_v43, %v886_v61  ;;  %v4999_v37 = vld [vmem:[#allocation50_spill] sm:$0xff]  ;;  %v5000_v9 = vld [vmem:[#allocation13_spill] sm:$0xff]  ;;  %v5010_v43 = vld [vmem:[#allocation19_spill] sm:$0xff] }
 0x49a   :  { %v1801_v42 = vpop.f32.mrf.mxu0 }
 0x49c   :  { %v3092_v63 = vpop.f32.mrf.mxu0 }
 0x49d   :  { %v1823_v38 = vpack.c.bf16 %v3092_v63, %v3091_v39  ;;  %v3480_v39 = vpop.eup %3479  ;;  %v883_v63 = vmul.f32 0.17677669, %v3470_v45 }
 0x49e   :  { %v1804_v28 = vpop.f32.mrf.mxu0  ;;  %v885_v33 = vmul.f32 0.17677669, %v3480_v39 }
 0x49f   :  { %v1822_v60 = vpack.c.bf16 %v1804_v28, %v1801_v42  ;;  %3093 = vmatprep.subr.bf16.mxu1 %v1823_v38  ;;  %v906_v42 = vmul.f32 %v4982_v32, %v874_v23  ;;  %v881_v28 = vmul.f32 0.17677669, %v3472_v41  ;;  %v912_v23 = vmul.f32 %v4991_v14, %v880_v5 }
 0x4a0   :  { %3094 = vmatpush3.bf16.msra.mxu1 %v1823_v38  ;;  %v2083_v2 = vpop.f32.mrf.mxu0  ;;  %v904_v38 = vmul.f32 %v4983_v15, %v872_v44  ;;  %v4993_v44 = vld [vmem:[#allocation46_spill] sm:$0xff]  ;;  %v4998_v15 = vld [vmem:[#allocation52_spill] sm:$0xff]  ;;  %v917_v25 = vmul.f32 %v4999_v37, %v885_v33  ;;  %v1817_v5 = vpack.c.bf16 %v4545_v52, %v4541_v47 }
 0x4a1   :  { %3481 = vrcp.f32 %v2083_v2  ;;  %3095 = vmatprep.subr.bf16.mxu1 %v1822_v60  ;;  %v4986_v2 = vld [vmem:[#allocation43_spill] sm:$0xff] }
 0x4a2   :  { %v3143_v0 = vpop.f32.mrf.mxu0  ;;  %v910_v11 = vmul.f32 %v4986_v2, %v878_v17  ;;  %v4995_v17 = vld [vmem:[#allocation28_spill] sm:$0xff] }
 0x4a3   :  { %v908_v0 = vmul.f32 %v4987_v12, %v876_v19  ;;  %v4996_v39 = vsub.s32 0, %v4995_v17 }
 0x4a4   :  { %3096 = vmatpush3.bf16.msra.mxu1 %v1822_v60  ;;  %v2086_v29 = vpop.f32.mrf.mxu0  ;;  %v4985_v60 = vld [vmem:[#allocation38_spill] sm:$0xff] }
 0x4a5   :  { %3097 = vmatprep.subr.bf16.mxu1 %v1821_v55  ;;  %v905_v57 = vmul.f32 %v4985_v60, %v873_v54  ;;  %v4989_v29 = vld [vmem:[#allocation42_spill] sm:$0xff]  ;;  %v1818_v54 = vpack.c.bf16 %v4557_v13, %v4551_v48 }
 0x4a6   :  { %v3144_v27 = vpop.f32.mrf.mxu0  ;;  %v909_v41 = vmul.f32 %v4989_v29, %v877_v26  ;;  %v919_v26 = vmul.f32 %v4998_v15, %v887_v35  ;;  %v5019_v15 = vld [vmem:[#allocation22_spill] sm:$0xff] }
 0x4a7   :  { %v4992_v27 = vld [vmem:[#allocation48_spill] sm:$0xff] }
 0x4a8   :  { %3098 = vmatpush3.bf16.msra.mxu1 %v1821_v55  ;;  %v911_v55 = vmul.f32 %v4988_v22, %v879_v51  ;;  %v915_v56 = vmul.f32 %v4992_v27, %v883_v63  ;;  %v4997_v51 = vld [vmem:[#allocation49_spill] sm:$0xff]  ;;  %v5004_v27 = vld [vmem:[#allocation15_spill] sm:$0xff] }
 0x4a9   :  { %3099 = vmatprep.subr.bf16.mxu1 %v1820_v8  ;;  %v916_v32 = vmul.f32 %v4997_v51, %v884_v24  ;;  %v5016_v51 = vld [vmem:[#allocation23_spill] sm:$0xff] }
 0x4ac   :  { %3100 = vmatpush3.bf16.msra.mxu1 %v1820_v8  ;;  %v913_v8 = vmul.f32 %v4993_v44, %v881_v28 }
 0x4ad   :  { %3101 = vmatprep.subr.bf16.mxu1 %v1819_v40 }
 0x4ae   :  { %v3482_v45 = vpop.eup %3481 }
 0x4af   :  { %v2335_v19 = vrot.slane %v3482_v45, %v4996_v39  ;;  %v1816_v45 = vpack.c.bf16 %v4547_v20, %v4543_v4  ;;  %v5006_v4 = vld [vmem:[#allocation16_spill] sm:$0xff]  ;;  %v5007_v20 = vld [vmem:[#allocation14_spill] sm:$0xff] }
 0x4b0   :  { %3102 = vmatpush3.bf16.msra.mxu1 %v1819_v40  ;;  %v5008_v44 = vpack.c.bf16 %v5006_v4, %v5007_v20 }
 0x4b1   :  { %3103 = vmatprep.subr.bf16.mxu1 %v1818_v54  ;;  %v4597_v63 = vmul.f32 %v2335_v19, %v904_v38  ;;  %v4599_v28 = vmul.f32 %v2335_v19, %v905_v57  ;;  %v4601_v61 = vmul.f32 %v2335_v19, %v906_v42  ;;  %v4603_v48 = vmul.f32 %v2335_v19, %v907_v62 }
 0x4b2   :  { %v4605_v13 = vmul.f32 %v2335_v19, %v908_v0  ;;  %v4607_v24 = vmul.f32 %v2335_v19, %v909_v41  ;;  %v4609_v35 = vmul.f32 %v2335_v19, %v910_v11  ;;  %v4611_v33 = vmul.f32 %v2335_v19, %v911_v55 }
 0x4b3   :  { %v2352_v47 = vpack.c.bf16 %v4599_v28, %v4597_v63  ;;  %v2353_v52 = vpack.c.bf16 %v4603_v48, %v4601_v61  ;;  %v4617_v38 = vmul.f32 %v2335_v19, %v912_v23  ;;  %v4619_v42 = vmul.f32 %v2335_v19, %v913_v8  ;;  %v5003_v23 = vld [vmem:[#allocation17_spill] sm:$0xff] }
 0x4b4   :  { %3104 = vmatpush3.bf16.msra.mxu1 %v1818_v54  ;;  %v2354_v40 = vpack.c.bf16 %v4607_v24, %v4605_v13  ;;  %v2355_v62 = vpack.c.bf16 %v4611_v33, %v4609_v35  ;;  %v4625_v60 = vmul.f32 %v2335_v19, %v914_v18  ;;  %v4627_v57 = vmul.f32 %v2335_v19, %v915_v56  ;;  %v5001_v18 = vld [vmem:[#allocation12_spill] sm:$0xff]  ;;  %v5009_v8 = vld [vmem:[#allocation21_spill] sm:$0xff]  ;;  %v2097_v54 = vpop.trf.xlu1 }
 0x4b5   :  { %3105 = vmatprep.subr.bf16.mxu1 %v1817_v5  ;;  %v2356_v2 = vpack.c.bf16 %v4619_v42, %v4617_v38  ;;  %v4631_v11 = vmul.f32 %v2335_v19, %v916_v32  ;;  %v4633_v12 = vmul.f32 %v2335_v19, %v917_v25  ;;  %v4635_v0 = vmul.f32 %v2335_v19, %v918_v7 }
 0x4b6   :  { %v2357_v22 = vpack.c.bf16 %v4627_v57, %v4625_v60  ;;  %v4639_v55 = vmul.f32 %v2335_v19, %v919_v26  ;;  %v5002_v14 = vpack.c.bf16 %v5000_v9, %v5001_v18  ;;  %v5005_v56 = vpack.c.bf16 %v5003_v23, %v5004_v27  ;;  %v5015_v19 = vld [vmem:[#allocation25_spill] sm:$0xff] }
 0x4b7   :  { %v2358_v29 = vpack.c.bf16 %v4633_v12, %v4631_v11  ;;  %v5011_v7 = vpack.c.bf16 %v5009_v8, %v5010_v43  ;;  %v5017_v32 = vpack.c.bf16 %v5015_v19, %v5016_v51 }
 0x4b8   :  { %3106 = vmatpush3.bf16.msra.mxu1 %v1817_v5  ;;  %v2359_v41 = vpack.c.bf16 %v4639_v55, %v4635_v0  ;;  %v2098_v39 = vpop.trf.xlu1 }
 0x4b9   :  { %3107 = vmatprep.subr.bf16.mxu1 %v1816_v45 }
 0x4bc   :  { %3108 = vmatpush3.bf16.msra.mxu1 %v1816_v45 }
 0x4bd   :  { %3145 = vmatprep.subr.bf16.mxu1 %v4446_v10 }
 0x4bf   :  { %3110 = vmatmul.mubr.bf16.vlgmr.msra.gmra.mxu1 %v5002_v14 }
 0x4c0   :  { %3113 = vmatprep.mubr.bf16.mxu1 %v5005_v56  ;;  %3146 = vmatpush3.bf16.msra.mxu1 %v4446_v10  ;;  %v5012_v10 = vld [vmem:[#allocation20_spill] sm:$0xff] }
 0x4c1   :  { %3147 = vmatprep.subr.bf16.mxu1 %v4449_v36 }
 0x4c4   :  { %3148 = vmatpush3.bf16.msra.mxu1 %v4449_v36  ;;  %v5013_v36 = vld [vmem:[#allocation18_spill] sm:$0xff] }
 0x4c5   :  { %3149 = vmatprep.subr.bf16.mxu1 %v4438_v46  ;;  %v5014_v17 = vpack.c.bf16 %v5012_v10, %v5013_v36 }
 0x4c7   :  { %3114 = vmatmul.mubr.bf16.gmra.mxu1 %v5008_v44 }
 0x4c8   :  { %3117 = vmatprep.mubr.bf16.mxu1 %v5011_v7  ;;  %3150 = vmatpush3.bf16.msra.mxu1 %v4438_v46  ;;  %v2099_v46 = vpop.trf.xlu1 }
 0x4c9   :  { %3151 = vmatprep.subr.bf16.mxu1 %v4441_v30 }
 0x4cc   :  { %3152 = vmatpush3.bf16.msra.mxu1 %v4441_v30  ;;  %v5018_v30 = vld [vmem:[#allocation24_spill] sm:$0xff]  ;;  %v2100_v37 = vpop.trf.xlu1 }
 0x4cd   :  { %3153 = vmatprep.subr.bf16.mxu1 %v4423_v58  ;;  %v5020_v26 = vpack.c.bf16 %v5018_v30, %v5019_v15 }
 0x4cf   :  { %3118 = vmatmul.mubr.bf16.gmra.mxu1 %v5014_v17 }
 0x4d0   :  { %3121 = vmatprep.mubr.bf16.mxu1 %v5017_v32  ;;  %3154 = vmatpush3.bf16.msra.mxu1 %v4423_v58  ;;  %v2101_v58 = vpop.trf.xlu1 }
 0x4d1   :  { %3155 = vmatprep.subr.bf16.mxu1 %v4427_v49 }
 0x4d4   :  { %3156 = vmatpush3.bf16.msra.mxu1 %v4427_v49  ;;  %v2102_v49 = vpop.trf.xlu1 }
 0x4d5   :  { %3157 = vmatprep.subr.bf16.mxu1 %v4411_v3 }
 0x4d7   :  { %3122 = vmatmul.mubr.bf16.gmra.mxu1 %v5020_v26 }
 0x4d8   :  { %3158 = vmatpush3.bf16.msra.mxu1 %v4411_v3  ;;  %3161 = vmatprep.mubr.bf16.mxu1 %v2097_v54  ;;  %v2103_v25 = vpop.trf.xlu1  ;;  %v4687_v3 = vld [vmem:[%s4768_s4] ss:$0 sm:$0xff]  ;;  %s3582_s4 = smov [#allocation8]  }
 0x4d9   :  { %3159 = vmatprep.subr.bf16.mxu1 %v4415_v16  ;;  %s2478_s18 = sshll.u32 %s3582_s4, 4  ;;  %s2479_s18 = int_to_ptr.vmem [resolvable:$true] %s2478_s18 }
 0x4da   :  { %s3543_s19 = scalar_lea.vmem %s2479_s18, 4096  ;;  %p3548_p2 = scmp.lt.s32.totalorder %s2479_s18, %s2479_s18 }
 0x4db   :  { %p3544_p1 = scmp.ne.s32.totalorder %s2479_s18, %s3543_s19  ;;  %p3549_p3 = scmp.lt.s32.totalorder %s3543_s19, %s3543_s19 }
 0x4dc   :  { %3160 = vmatpush3.bf16.msra.mxu1 %v4415_v16  ;;  %v2104_v5 = vpop.trf.xlu1 }
 0x4dd   :  { %p3550_p4 = por %p3549_p3, %p3548_p2 }
 0x4df   :  { %3162 = vmatmul.mubr.bf16.vlgmr.msra.gmra.mxu1 %v2098_v39  ;;  %p3551_p5 = pnand %p3550_p4, %p3544_p1 }
 0x4e0   :  { %3165 = vmatprep.mubr.bf16.mxu1 %v2099_v46 }
 0x4e7   :  { %3166 = vmatmul.mubr.bf16.gmra.mxu1 %v2100_v37 }
 0x4e8   :  { %3169 = vmatprep.mubr.bf16.mxu1 %v2101_v58 }
 0x4ef   :  { %3170 = vmatmul.mubr.bf16.gmra.mxu1 %v2102_v49 }
 0x4f0   :  { %3173 = vmatprep.mubr.bf16.mxu1 %v2103_v25 }
 0x4f7   :  { %3174 = vmatmul.mubr.bf16.gmra.mxu1 %v2104_v5 }
 0x4f8   :  { %3225 = vmatprep.mubr.bf16.mxu1 %v2352_v47 }
 0x57f   :  { %v3111_v63 = vpop.f32.mrf.mxu1 }
 0x580   :  { %v1902_v16 = vadd.f32 %v3111_v63, %v4687_v3 }
 0x581   :  { %v1893_v28 = vpop.f32.mrf.mxu1 }
 0x582   :  { %1958 = vst [vmem:[#allocation8 + $0x10] sm:$0xff] %v1902_v16  ;;  %v1894_v45 = vadd.f32 %v4687_v3, %v1893_v28 }
 0x583   :  { %v3112_v9 = vpop.f32.mrf.mxu1 }
 0x584   :  { %1956 = vst [vmem:[#allocation8] sm:$0xff] %v1894_v45  ;;  %v1905_v18 = vadd.f32 %v3112_v9, %v4687_v3 }
 0x585   :  { %v1896_v14 = vpop.f32.mrf.mxu1 }
 0x586   :  { %1959 = vst [vmem:[#allocation8 + $0x18] sm:$0xff] %v1905_v18  ;;  %v1897_v47 = vadd.f32 %v4687_v3, %v1896_v14 }
 0x587   :  { %v3115_v23 = vpop.f32.mrf.mxu1 }
 0x588   :  { %1957 = vst [vmem:[#allocation8 + $0x8] sm:$0xff] %v1897_v47  ;;  %v1918_v27 = vadd.f32 %v3115_v23, %v4687_v3 }
 0x589   :  { %v1909_v56 = vpop.f32.mrf.mxu1 }
 0x58a   :  { %1962 = vst [vmem:[#allocation8 + $0x30] sm:$0xff] %v1918_v27  ;;  %v1910_v4 = vadd.f32 %v4687_v3, %v1909_v56 }
 0x58b   :  { %v3116_v20 = vpop.f32.mrf.mxu1 }
 0x58c   :  { %1960 = vst [vmem:[#allocation8 + $0x20] sm:$0xff] %v1910_v4  ;;  %v1921_v44 = vadd.f32 %v3116_v20, %v4687_v3 }
 0x58d   :  { %v1912_v8 = vpop.f32.mrf.mxu1 }
 0x58e   :  { %1963 = vst [vmem:[#allocation8 + $0x38] sm:$0xff] %v1921_v44  ;;  %v1913_v43 = vadd.f32 %v4687_v3, %v1912_v8 }
 0x58f   :  { %v3119_v7 = vpop.f32.mrf.mxu1 }
 0x590   :  { %1961 = vst [vmem:[#allocation8 + $0x28] sm:$0xff] %v1913_v43  ;;  %v1934_v54 = vadd.f32 %v3119_v7, %v4687_v3 }
 0x591   :  { %v1925_v10 = vpop.f32.mrf.mxu1 }
 0x592   :  { %1966 = vst [vmem:[#allocation8 + $0x50] sm:$0xff] %v1934_v54  ;;  %v1926_v36 = vadd.f32 %v4687_v3, %v1925_v10 }
 0x593   :  { %v3120_v17 = vpop.f32.mrf.mxu1 }
 0x594   :  { %1964 = vst [vmem:[#allocation8 + $0x40] sm:$0xff] %v1926_v36  ;;  %v1937_v39 = vadd.f32 %v3120_v17, %v4687_v3 }
 0x595   :  { %v1928_v19 = vpop.f32.mrf.mxu1 }
 0x596   :  { %1967 = vst [vmem:[#allocation8 + $0x58] sm:$0xff] %v1937_v39  ;;  %v1929_v51 = vadd.f32 %v4687_v3, %v1928_v19 }
 0x597   :  { %v3123_v32 = vpop.f32.mrf.mxu1 }
 0x598   :  { %1965 = vst [vmem:[#allocation8 + $0x48] sm:$0xff] %v1929_v51  ;;  %v1950_v46 = vadd.f32 %v3123_v32, %v4687_v3 }
 0x599   :  { %v1941_v30 = vpop.f32.mrf.mxu1 }
 0x59a   :  { %1970 = vst [vmem:[#allocation8 + $0x70] sm:$0xff] %v1950_v46  ;;  %v1942_v15 = vadd.f32 %v4687_v3, %v1941_v30 }
 0x59b   :  { %v3124_v26 = vpop.f32.mrf.mxu1 }
 0x59c   :  { %1968 = vst [vmem:[#allocation8 + $0x60] sm:$0xff] %v1942_v15  ;;  %v1953_v37 = vadd.f32 %v3124_v26, %v4687_v3 }
 0x59d   :  { %v1944_v58 = vpop.f32.mrf.mxu1 }
 0x59e   :  { %1971 = vst [vmem:[#allocation8 + $0x78] sm:$0xff] %v1953_v37  ;;  %v1945_v49 = vadd.f32 %v4687_v3, %v1944_v58 }
 0x59f   :  { %v3163_v25 = vpop.f32.mrf.mxu1 }
 0x5a0   :  { %1969 = vst [vmem:[#allocation8 + $0x68] sm:$0xff] %v1945_v49 }
 0x5a1   :  { %v2139_v5 = vpop.f32.mrf.mxu1 }
 0x5a3   :  { %v3164_v63 = vpop.f32.mrf.mxu1 }
 0x5a4   :  { %v2587_v45 = vpack.c.bf16 %v3164_v63, %v3163_v25 }
 0x5a5   :  { %v2142_v16 = vpop.f32.mrf.mxu1 }
 0x5a6   :  { %v2584_v28 = vpack.c.bf16 %v2142_v16, %v2139_v5 }
 0x5a7   :  { %v3167_v9 = vpop.f32.mrf.mxu1 }
 0x5a8   :  { %3193 = vmatprep.mubr.msk.bf16.mxu0 %vm3869_vm10, %v2584_v28 }
 0x5a9   :  { %v2155_v18 = vpop.f32.mrf.mxu1  ;;  %3194 = vmatmul.mubr.msk.bf16.vlgmr.msra.gmra.mxu0 %vm3847_vm6, %v2587_v45 }
 0x5ab   :  { %v3168_v14 = vpop.f32.mrf.mxu1 }
 0x5ac   :  { %v2593_v27 = vpack.c.bf16 %v3168_v14, %v3167_v9 }
 0x5ad   :  { %v2158_v47 = vpop.f32.mrf.mxu1 }
 0x5ae   :  { %v2590_v23 = vpack.c.bf16 %v2158_v47, %v2155_v18 }
 0x5af   :  { %v3171_v56 = vpop.f32.mrf.mxu1 }
 0x5b0   :  { %3197 = vmatprep.mubr.msk.bf16.mxu0 %vm3829_vm1, %v2590_v23 }
 0x5b1   :  { %v2171_v4 = vpop.f32.mrf.mxu1  ;;  %3198 = vmatmul.mubr.msk.bf16.gmra.mxu0 %vm3805_vm14, %v2593_v27 }
 0x5b3   :  { %v3172_v20 = vpop.f32.mrf.mxu1 }
 0x5b4   :  { %v2599_v8 = vpack.c.bf16 %v3172_v20, %v3171_v56 }
 0x5b5   :  { %v2174_v44 = vpop.f32.mrf.mxu1 }
 0x5b6   :  { %v2596_v59 = vpack.c.bf16 %v2174_v44, %v2171_v4 }
 0x5b7   :  { %v3175_v43 = vpop.f32.mrf.mxu1 }
 0x5b8   :  { %3201 = vmatprep.mubr.msk.bf16.mxu0 %vm3783_vm11, %v2596_v59 }
 0x5b9   :  { %v2187_v1 = vpop.f32.mrf.mxu1  ;;  %3202 = vmatmul.mubr.msk.bf16.gmra.mxu0 %vm3761_vm8, %v2599_v8 }
 0x5bb   :  { %v3176_v7 = vpop.f32.mrf.mxu1 }
 0x5bc   :  { %v2605_v10 = vpack.c.bf16 %v3176_v7, %v3175_v43 }
 0x5bd   :  { %v2190_v54 = vpop.f32.mrf.mxu1 }
 0x5be   :  { %v2602_v31 = vpack.c.bf16 %v2190_v54, %v2187_v1 }
 0x5c0   :  { %3205 = vmatprep.mubr.msk.bf16.mxu0 %vm3740_vm5, %v2602_v31 }
 0x5c1   :  { %3206 = vmatmul.mubr.msk.bf16.gmra.mxu0 %vm3718_vm2, %v2605_v10 }
 0x669   :  { %v3195_v53 = vpop.f32.mrf.mxu0 }
 0x66b   :  { %v2260_v36 = vpop.f32.mrf.mxu0 }
 0x66d   :  { %v3196_v17 = vpop.f32.mrf.mxu0 }
 0x66e   :  { %v2324_v28 = vpack.c.bf16 %v3196_v17, %v3195_v53 }
 0x66f   :  { %v2263_v39 = vpop.f32.mrf.mxu0 }
 0x670   :  { %v2323_v45 = vpack.c.bf16 %v2263_v39, %v2260_v36 }
 0x671   :  { %v3199_v34 = vpop.f32.mrf.mxu0 }
 0x673   :  { %v2276_v19 = vpop.f32.mrf.mxu0 }
 0x675   :  { %v3200_v51 = vpop.f32.mrf.mxu0 }
 0x676   :  { %v2326_v63 = vpack.c.bf16 %v3200_v51, %v3199_v34 }
 0x677   :  { %v2279_v32 = vpop.f32.mrf.mxu0 }
 0x678   :  { %v2325_v16 = vpack.c.bf16 %v2279_v32, %v2276_v19 }
 0x679   :  { %v3203_v50 = vpop.f32.mrf.mxu0 }
 0x67b   :  { %v2292_v46 = vpop.f32.mrf.mxu0 }
 0x67d   :  { %v3204_v30 = vpop.f32.mrf.mxu0 }
 0x67e   :  { %v2328_v25 = vpack.c.bf16 %v3204_v30, %v3203_v50 }
 0x67f   :  { %v2295_v15 = vpop.f32.mrf.mxu0 }
 0x680   :  { %v2327_v5 = vpack.c.bf16 %v2295_v15, %v2292_v46 }
 0x681   :  { %v3207_v26 = vpop.f32.mrf.mxu0 }
 0x683   :  { %v2308_v37 = vpop.f32.mrf.mxu0 }
 0x685   :  { %v3208_v58 = vpop.f32.mrf.mxu0 }
 0x686   :  { %v2330_v21 = vpack.c.bf16 %v3208_v58, %v3207_v26 }
 0x687   :  { %v2311_v49 = vpop.f32.mrf.mxu0 }
 0x688   :  { %3209 = vmatprep.subr.bf16.mxu1 %v2330_v21  ;;  %v2329_v6 = vpack.c.bf16 %v2311_v49, %v2308_v37 }
 0x689   :  { %3210 = vmatpush3.bf16.msra.mxu1 %v2330_v21 }
 0x68a   :  { %3211 = vmatprep.subr.bf16.mxu1 %v2329_v6 }
 0x68d   :  { %3212 = vmatpush3.bf16.msra.mxu1 %v2329_v6 }
 0x68e   :  { %3213 = vmatprep.subr.bf16.mxu1 %v2328_v25 }
 0x691   :  { %3214 = vmatpush3.bf16.msra.mxu1 %v2328_v25 }
 0x692   :  { %3215 = vmatprep.subr.bf16.mxu1 %v2327_v5 }
 0x695   :  { %3216 = vmatpush3.bf16.msra.mxu1 %v2327_v5 }
 0x696   :  { %3217 = vmatprep.subr.bf16.mxu1 %v2326_v63 }
 0x699   :  { %3218 = vmatpush3.bf16.msra.mxu1 %v2326_v63 }
 0x69a   :  { %3219 = vmatprep.subr.bf16.mxu1 %v2325_v16 }
 0x69d   :  { %3220 = vmatpush3.bf16.msra.mxu1 %v2325_v16 }
 0x69e   :  { %3221 = vmatprep.subr.bf16.mxu1 %v2324_v28 }
 0x6a1   :  { %3222 = vmatpush3.bf16.msra.mxu1 %v2324_v28 }
 0x6a2   :  { %3223 = vmatprep.subr.bf16.mxu1 %v2323_v45 }
 0x6a5   :  { %3224 = vmatpush3.bf16.msra.mxu1 %v2323_v45 }
 0x6a8   :  { %3226 = vmatmul.mubr.bf16.vlgmr.msra.gmra.mxu1 %v2353_v52 }
 0x6a9   :  { %3229 = vmatprep.mubr.bf16.mxu1 %v2354_v40 }
 0x6b0   :  { %3230 = vmatmul.mubr.bf16.gmra.mxu1 %v2355_v62 }
 0x6b1   :  { %3233 = vmatprep.mubr.bf16.mxu1 %v2356_v2 }
 0x6b8   :  { %3234 = vmatmul.mubr.bf16.gmra.mxu1 %v2357_v22 }
 0x6b9   :  { %3237 = vmatprep.mubr.bf16.mxu1 %v2358_v29 }
 0x6c0   :  { %3238 = vmatmul.mubr.bf16.gmra.mxu1 %v2359_v41 }
 0x768   :  { %v3227_v61 = vpop.f32.mrf.mxu1 }
 0x769   :  { %v2403_v48 = vadd.f32 %v3227_v61, %v4687_v3 }
 0x76a   :  { %v2394_v13 = vpop.f32.mrf.mxu1 }
 0x76b   :  { %2459 = vst [vmem:[#allocation8 + $0x90] sm:$0xff] %v2403_v48  ;;  %v2395_v24 = vadd.f32 %v4687_v3, %v2394_v13 }
 0x76c   :  { %v3228_v35 = vpop.f32.mrf.mxu1 }
 0x76d   :  { %2457 = vst [vmem:[#allocation8 + $0x80] sm:$0xff] %v2395_v24  ;;  %v2406_v33 = vadd.f32 %v3228_v35, %v4687_v3 }
 0x76e   :  { %v2397_v52 = vpop.f32.mrf.mxu1 }
 0x76f   :  { %2460 = vst [vmem:[#allocation8 + $0x98] sm:$0xff] %v2406_v33  ;;  %v2398_v38 = vadd.f32 %v4687_v3, %v2397_v52 }
 0x770   :  { %v3231_v42 = vpop.f32.mrf.mxu1 }
 0x771   :  { %2458 = vst [vmem:[#allocation8 + $0x88] sm:$0xff] %v2398_v38  ;;  %v2419_v40 = vadd.f32 %v3231_v42, %v4687_v3 }
 0x772   :  { %v2410_v62 = vpop.f32.mrf.mxu1 }
 0x773   :  { %2463 = vst [vmem:[#allocation8 + $0xb0] sm:$0xff] %v2419_v40  ;;  %v2411_v60 = vadd.f32 %v4687_v3, %v2410_v62 }
 0x774   :  { %v3232_v57 = vpop.f32.mrf.mxu1 }
 0x775   :  { %2461 = vst [vmem:[#allocation8 + $0xa0] sm:$0xff] %v2411_v60  ;;  %v2422_v2 = vadd.f32 %v3232_v57, %v4687_v3 }
 0x776   :  { %v2413_v11 = vpop.f32.mrf.mxu1 }
 0x777   :  { %2464 = vst [vmem:[#allocation8 + $0xb8] sm:$0xff] %v2422_v2  ;;  %v2414_v12 = vadd.f32 %v4687_v3, %v2413_v11 }
 0x778   :  { %v3235_v0 = vpop.f32.mrf.mxu1 }
 0x779   :  { %2462 = vst [vmem:[#allocation8 + $0xa8] sm:$0xff] %v2414_v12  ;;  %v2435_v22 = vadd.f32 %v3235_v0, %v4687_v3 }
 0x77a   :  { %v2426_v55 = vpop.f32.mrf.mxu1 }
 0x77b   :  { %2467 = vst [vmem:[#allocation8 + $0xd0] sm:$0xff] %v2435_v22  ;;  %v2427_v29 = vadd.f32 %v4687_v3, %v2426_v55 }
 0x77c   :  { %v3236_v41 = vpop.f32.mrf.mxu1 }
 0x77d   :  { %2465 = vst [vmem:[#allocation8 + $0xc0] sm:$0xff] %v2427_v29  ;;  %v2438_v9 = vadd.f32 %v3236_v41, %v4687_v3 }
 0x77e   :  { %v2429_v18 = vpop.f32.mrf.mxu1 }
 0x77f   :  { %2468 = vst [vmem:[#allocation8 + $0xd8] sm:$0xff] %v2438_v9  ;;  %v2430_v14 = vadd.f32 %v4687_v3, %v2429_v18 }
 0x780   :  { %v3239_v47 = vpop.f32.mrf.mxu1 }
 0x781   :  { %2466 = vst [vmem:[#allocation8 + $0xc8] sm:$0xff] %v2430_v14  ;;  %v2451_v23 = vadd.f32 %v3239_v47, %v4687_v3 }
 0x782   :  { %v2442_v27 = vpop.f32.mrf.mxu1 }
 0x783   :  { %2471 = vst [vmem:[#allocation8 + $0xf0] sm:$0xff] %v2451_v23  ;;  %v2443_v56 = vadd.f32 %v4687_v3, %v2442_v27 }
 0x784   :  { %v3240_v4 = vpop.f32.mrf.mxu1 }
 0x785   :  { %2469 = vst [vmem:[#allocation8 + $0xe0] sm:$0xff] %v2443_v56  ;;  %v2454_v20 = vadd.f32 %v3240_v4, %v4687_v3 }
 0x786   :  { %v2445_v44 = vpop.f32.mrf.mxu1 }
 0x787   :  { %2472 = vst [vmem:[#allocation8 + $0xf8] sm:$0xff] %v2454_v20  ;;  %v2446_v59 = vadd.f32 %v4687_v3, %v2445_v44 }
 0x789   :  { %2470 = vst [vmem:[#allocation8 + $0xe8] sm:$0xff] %v2446_v59 }
 0x78a   :  { %3554 = shalt.err (!%p3551_p5)
}
 0x78b   :  { %2484 = dma.vmem_to_hbm [thread:$0]  %s2479_s18, 4096, %s4769_s5, [#allocation4], %s3573_s28, %s3573_s28, %s3574_s29  }
 0x78c   :  { %3567 = dma.done.wait [#allocation4], 4096  }
 0x78d   :  { %3568 = vsyncadd [#allocation4], 4294963200 }
 0x78e   :  { %2488 = vsyncpa [#allocation3], 1 }
 0x78f   :  { %2489 = vsyncpa [#allocation6], 1 }
 0x790   :  { %2490 = vsyncpa [#allocation4], 1 }

</bundles_post_ra>
